<compile_context>
chip_gen: v7x
topology: tpu7x:2x2x1
jax: 0.10.0
libtpu: 0.0.40
codegen_flags: <defaults>
</compile_context>

<pallas_src>
import functools

import jax
import jax.numpy as jnp
from jax.experimental import pallas as pl
from jax.experimental.pallas import tpu as pltpu


def _glove_gather_kernel(ids_ref, emb_hbm, *rest, token_tile, apply_mask):
    # Argument layout:
    #   ids_ref : (N_pad,) int32, scalar-prefetched token ids (SMEM)
    #   emb_hbm : (V, D_pad) embedding table, left in HBM (pl.ANY)
    #   [mask_ref]: (T, D_pad) inverted-dropout scale block (VMEM), training only
    #   out_ref : (T, D_pad) output block (VMEM)
    #   rows    : (T, D_pad) VMEM scratch for the gathered rows
    #   sems    : (T,) DMA semaphores, one per row copy
    if apply_mask:
        mask_ref, out_ref, rows, sems = rest
    else:
        out_ref, rows, sems = rest

    base = pl.program_id(0) * token_tile

    # Issue one row DMA per token in this tile (they all run concurrently),
    # then wait for all of them.
    copies = []
    for t in range(token_tile):
        cp = pltpu.make_async_copy(
            emb_hbm.at[ids_ref[base + t]],   # (D_pad,) row in HBM
            rows.at[t],                      # (D_pad,) slot in VMEM scratch
            sems.at[t])
        cp.start()
        copies.append(cp)
    for cp in copies:
        cp.wait()

    gathered = rows[...]
    if apply_mask:
        gathered = gathered * mask_ref[...]
    out_ref[...] = gathered.astype(out_ref.dtype)


def _round_up(a, b):
    return (a + b - 1) // b * b


def glove_embedding_forward(x, emb_table, *, dropout_p=0.3, training=False,
                            rng_key=None, token_tile=128):
    """Forward pass of GloveEmbedding with elmo_mode=False.

    x:          (batch, seq) integer token ids
    emb_table:  (vocab, emb_dim) float embedding matrix
    returns:    (batch, seq, emb_dim), dtype of emb_table
    """
    B, S = x.shape
    V, D = emb_table.shape
    N = B * S

    D_pad = _round_up(D, 128)                # lane-dense output blocks
    T = min(token_tile, _round_up(N, 8))     # tokens per grid step
    N_pad = _round_up(N, T)
    grid = (N_pad // T,)

    ids = jnp.zeros((N_pad,), jnp.int32).at[:N].set(
        x.reshape(-1).astype(jnp.int32))
    emb_padded = emb_table if D_pad == D else jnp.pad(
        emb_table, ((0, 0), (0, D_pad - D)))

    apply_mask = bool(training) and dropout_p > 0.0

    inputs = [ids, emb_padded]
    in_specs = [pl.BlockSpec(memory_space=pl.ANY)]   # table stays in HBM
    if apply_mask:
        if rng_key is None:
            rng_key = jax.random.PRNGKey(0)
        keep = jax.random.bernoulli(rng_key, 1.0 - dropout_p, (N_pad, D_pad))
        mask = keep.astype(emb_table.dtype) * (1.0 / (1.0 - dropout_p))
        inputs.append(mask)
        in_specs.append(pl.BlockSpec((T, D_pad), lambda i, ids_r: (i, 0)))

    kernel = functools.partial(_glove_gather_kernel,
                               token_tile=T, apply_mask=apply_mask)

    out = pl.pallas_call(
        kernel,
        out_shape=jax.ShapeDtypeStruct((N_pad, D_pad), emb_table.dtype),
        grid_spec=pltpu.PrefetchScalarGridSpec(
            num_scalar_prefetch=1,           # token ids -> SMEM
            grid=grid,
            in_specs=in_specs,
            out_specs=pl.BlockSpec((T, D_pad), lambda i, ids_r: (i, 0)),
            scratch_shapes=[
                pltpu.VMEM((T, D_pad), emb_table.dtype),   # gathered rows
                pltpu.SemaphoreType.DMA((T,)),             # one sem per row DMA
            ],
        ),
        compiler_params=pltpu.CompilerParams(
            dimension_semantics=("parallel",)),
    )(*inputs)

    return out[:N, :D].reshape(B, S, D)


if __name__ == "__main__":
    # Small shapes consistent with the module: (batch, seq) int ids + (V, D) table.
    VOCAB, EMB_DIM = 100, 32
    BATCH, SEQ = 2, 8
    DROPOUT = 0.3

    key = jax.random.PRNGKey(0)
    k_emb, k_x, k_drop = jax.random.split(key, 3)

    # nn.init.uniform_(embedding.weight, -0.05, 0.05)
    emb_table = jax.random.uniform(k_emb, (VOCAB, EMB_DIM), jnp.float32,
                                   minval=-0.05, maxval=0.05)
    x = jax.random.randint(k_x, (BATCH, SEQ), 0, VOCAB, dtype=jnp.int32)

    # Eval mode: dropout is identity -> must match a plain gather.
    out_eval = jax.block_until_ready(
        glove_embedding_forward(x, emb_table, dropout_p=DROPOUT, training=False))
    ref = jnp.take(emb_table, x, axis=0)
    assert out_eval.shape == (BATCH, SEQ, EMB_DIM)
    assert out_eval.dtype == jnp.float32
    assert jnp.allclose(out_eval, ref, atol=1e-6), "embedding gather mismatch"

    # Training mode: inverted dropout -> each element is 0 or ref/(1-p).
    out_train = jax.block_until_ready(
        glove_embedding_forward(x, emb_table, dropout_p=DROPOUT, training=True,
                                rng_key=k_drop))
    assert out_train.shape == (BATCH, SEQ, EMB_DIM)
    assert out_train.dtype == jnp.float32
    dropped = jnp.abs(out_train) < 1e-12
    kept_ok = jnp.abs(out_train * (1.0 - DROPOUT) - ref) < 1e-5
    assert bool(jnp.all(dropped | kept_ok)), "dropout semantics mismatch"

    print("KERNEL_OK")
</pallas_src>

<mosaic_0001>
module attributes {stable_mosaic.version = 11 : i64} {
  func.func @_glove_gather_kernel(%arg0: i32, %arg1: memref<16xi32, #tpu.memory_space<smem>>, %arg2: memref<100x128xf32, #tpu.memory_space<any>>, %arg3: memref<16x128xf32, #tpu.memory_space<vmem>>, %arg4: memref<16x128xf32, #tpu.memory_space<vmem>>, %arg5: memref<16x!tpu.dma_semaphore, #tpu.memory_space<semaphore_mem>>) attributes {dimension_semantics = [#tpu.dimension_semantics<parallel>], iteration_bounds = array<i64: 1>, scalar_prefetch = 1 : i64, scratch_operands = 2 : i64, tpu.core_type = #tpu.core_type<tc>, window_params = [{}, {transform_indices = @transform_1, window_bounds = array<i64: 16, 128>}]} {
    %c16_i32 = arith.constant 16 : i32
    %0 = arith.muli %arg0, %c16_i32 : i32
    %c0_i32 = arith.constant 0 : i32
    %1 = arith.addi %0, %c0_i32 : i32
    %2 = arith.index_cast %1 : i32 to index
    %3 = memref.load %arg1[%2] : memref<16xi32, #tpu.memory_space<smem>>
    %c0_i32_0 = arith.constant 0 : i32
    %c0_i32_1 = arith.constant 0 : i32
    %c0_i32_2 = arith.constant 0 : i32
    %4 = tpu.memref_slice %arg2[%3, %c0_i32_2] : memref<100x128xf32, #tpu.memory_space<any>> -> memref<1x128xf32, #tpu.memory_space<any>>
    %5 = tpu.memref_squeeze %4 : memref<1x128xf32, #tpu.memory_space<any>> -> memref<128xf32, #tpu.memory_space<any>>
    %c0_i32_3 = arith.constant 0 : i32
    %6 = tpu.memref_slice %arg4[%c0_i32_0, %c0_i32_3] : memref<16x128xf32, #tpu.memory_space<vmem>> -> memref<1x128xf32, #tpu.memory_space<vmem>>
    %7 = tpu.memref_squeeze %6 : memref<1x128xf32, #tpu.memory_space<vmem>> -> memref<128xf32, #tpu.memory_space<vmem>>
    %8 = tpu.memref_slice %arg5[%c0_i32_1] : memref<16x!tpu.dma_semaphore, #tpu.memory_space<semaphore_mem>> -> memref<1x!tpu.dma_semaphore, #tpu.memory_space<semaphore_mem>>
    %9 = tpu.memref_squeeze %8 : memref<1x!tpu.dma_semaphore, #tpu.memory_space<semaphore_mem>> -> memref<!tpu.dma_semaphore, #tpu.memory_space<semaphore_mem>>
    tpu.enqueue_dma source(%5 : memref<128xf32, #tpu.memory_space<any>>) target(%7 : memref<128xf32, #tpu.memory_space<vmem>>) target_semaphore(%9 : memref<!tpu.dma_semaphore, #tpu.memory_space<semaphore_mem>>)
    %c1_i32 = arith.constant 1 : i32
    %10 = arith.addi %0, %c1_i32 : i32
    %11 = arith.index_cast %10 : i32 to index
    %12 = memref.load %arg1[%11] : memref<16xi32, #tpu.memory_space<smem>>
    %c1_i32_4 = arith.constant 1 : i32
    %c1_i32_5 = arith.constant 1 : i32
    %c0_i32_6 = arith.constant 0 : i32
    %13 = tpu.memref_slice %arg2[%12, %c0_i32_6] : memref<100x128xf32, #tpu.memory_space<any>> -> memref<1x128xf32, #tpu.memory_space<any>>
    %14 = tpu.memref_squeeze %13 : memref<1x128xf32, #tpu.memory_space<any>> -> memref<128xf32, #tpu.memory_space<any>>
    %c0_i32_7 = arith.constant 0 : i32
    %15 = tpu.memref_slice %arg4[%c1_i32_4, %c0_i32_7] : memref<16x128xf32, #tpu.memory_space<vmem>> -> memref<1x128xf32, #tpu.memory_space<vmem>>
    %16 = tpu.memref_squeeze %15 : memref<1x128xf32, #tpu.memory_space<vmem>> -> memref<128xf32, #tpu.memory_space<vmem>>
    %17 = tpu.memref_slice %arg5[%c1_i32_5] : memref<16x!tpu.dma_semaphore, #tpu.memory_space<semaphore_mem>> -> memref<1x!tpu.dma_semaphore, #tpu.memory_space<semaphore_mem>>
    %18 = tpu.memref_squeeze %17 : memref<1x!tpu.dma_semaphore, #tpu.memory_space<semaphore_mem>> -> memref<!tpu.dma_semaphore, #tpu.memory_space<semaphore_mem>>
    tpu.enqueue_dma source(%14 : memref<128xf32, #tpu.memory_space<any>>) target(%16 : memref<128xf32, #tpu.memory_space<vmem>>) target_semaphore(%18 : memref<!tpu.dma_semaphore, #tpu.memory_space<semaphore_mem>>)
    %c2_i32 = arith.constant 2 : i32
    %19 = arith.addi %0, %c2_i32 : i32
    %20 = arith.index_cast %19 : i32 to index
    %21 = memref.load %arg1[%20] : memref<16xi32, #tpu.memory_space<smem>>
    %c2_i32_8 = arith.constant 2 : i32
    %c2_i32_9 = arith.constant 2 : i32
    %c0_i32_10 = arith.constant 0 : i32
    %22 = tpu.memref_slice %arg2[%21, %c0_i32_10] : memref<100x128xf32, #tpu.memory_space<any>> -> memref<1x128xf32, #tpu.memory_space<any>>
    %23 = tpu.memref_squeeze %22 : memref<1x128xf32, #tpu.memory_space<any>> -> memref<128xf32, #tpu.memory_space<any>>
    %c0_i32_11 = arith.constant 0 : i32
    %24 = tpu.memref_slice %arg4[%c2_i32_8, %c0_i32_11] : memref<16x128xf32, #tpu.memory_space<vmem>> -> memref<1x128xf32, #tpu.memory_space<vmem>>
    %25 = tpu.memref_squeeze %24 : memref<1x128xf32, #tpu.memory_space<vmem>> -> memref<128xf32, #tpu.memory_space<vmem>>
    %26 = tpu.memref_slice %arg5[%c2_i32_9] : memref<16x!tpu.dma_semaphore, #tpu.memory_space<semaphore_mem>> -> memref<1x!tpu.dma_semaphore, #tpu.memory_space<semaphore_mem>>
    %27 = tpu.memref_squeeze %26 : memref<1x!tpu.dma_semaphore, #tpu.memory_space<semaphore_mem>> -> memref<!tpu.dma_semaphore, #tpu.memory_space<semaphore_mem>>
    tpu.enqueue_dma source(%23 : memref<128xf32, #tpu.memory_space<any>>) target(%25 : memref<128xf32, #tpu.memory_space<vmem>>) target_semaphore(%27 : memref<!tpu.dma_semaphore, #tpu.memory_space<semaphore_mem>>)
    %c3_i32 = arith.constant 3 : i32
    %28 = arith.addi %0, %c3_i32 : i32
    %29 = arith.index_cast %28 : i32 to index
    %30 = memref.load %arg1[%29] : memref<16xi32, #tpu.memory_space<smem>>
    %c3_i32_12 = arith.constant 3 : i32
    %c3_i32_13 = arith.constant 3 : i32
    %c0_i32_14 = arith.constant 0 : i32
    %31 = tpu.memref_slice %arg2[%30, %c0_i32_14] : memref<100x128xf32, #tpu.memory_space<any>> -> memref<1x128xf32, #tpu.memory_space<any>>
    %32 = tpu.memref_squeeze %31 : memref<1x128xf32, #tpu.memory_space<any>> -> memref<128xf32, #tpu.memory_space<any>>
    %c0_i32_15 = arith.constant 0 : i32
    %33 = tpu.memref_slice %arg4[%c3_i32_12, %c0_i32_15] : memref<16x128xf32, #tpu.memory_space<vmem>> -> memref<1x128xf32, #tpu.memory_space<vmem>>
    %34 = tpu.memref_squeeze %33 : memref<1x128xf32, #tpu.memory_space<vmem>> -> memref<128xf32, #tpu.memory_space<vmem>>
    %35 = tpu.memref_slice %arg5[%c3_i32_13] : memref<16x!tpu.dma_semaphore, #tpu.memory_space<semaphore_mem>> -> memref<1x!tpu.dma_semaphore, #tpu.memory_space<semaphore_mem>>
    %36 = tpu.memref_squeeze %35 : memref<1x!tpu.dma_semaphore, #tpu.memory_space<semaphore_mem>> -> memref<!tpu.dma_semaphore, #tpu.memory_space<semaphore_mem>>
    tpu.enqueue_dma source(%32 : memref<128xf32, #tpu.memory_space<any>>) target(%34 : memref<128xf32, #tpu.memory_space<vmem>>) target_semaphore(%36 : memref<!tpu.dma_semaphore, #tpu.memory_space<semaphore_mem>>)
    %c4_i32 = arith.constant 4 : i32
    %37 = arith.addi %0, %c4_i32 : i32
    %38 = arith.index_cast %37 : i32 to index
    %39 = memref.load %arg1[%38] : memref<16xi32, #tpu.memory_space<smem>>
    %c4_i32_16 = arith.constant 4 : i32
    %c4_i32_17 = arith.constant 4 : i32
    %c0_i32_18 = arith.constant 0 : i32
    %40 = tpu.memref_slice %arg2[%39, %c0_i32_18] : memref<100x128xf32, #tpu.memory_space<any>> -> memref<1x128xf32, #tpu.memory_space<any>>
    %41 = tpu.memref_squeeze %40 : memref<1x128xf32, #tpu.memory_space<any>> -> memref<128xf32, #tpu.memory_space<any>>
    %c0_i32_19 = arith.constant 0 : i32
    %42 = tpu.memref_slice %arg4[%c4_i32_16, %c0_i32_19] : memref<16x128xf32, #tpu.memory_space<vmem>> -> memref<1x128xf32, #tpu.memory_space<vmem>>
    %43 = tpu.memref_squeeze %42 : memref<1x128xf32, #tpu.memory_space<vmem>> -> memref<128xf32, #tpu.memory_space<vmem>>
    %44 = tpu.memref_slice %arg5[%c4_i32_17] : memref<16x!tpu.dma_semaphore, #tpu.memory_space<semaphore_mem>> -> memref<1x!tpu.dma_semaphore, #tpu.memory_space<semaphore_mem>>
    %45 = tpu.memref_squeeze %44 : memref<1x!tpu.dma_semaphore, #tpu.memory_space<semaphore_mem>> -> memref<!tpu.dma_semaphore, #tpu.memory_space<semaphore_mem>>
    tpu.enqueue_dma source(%41 : memref<128xf32, #tpu.memory_space<any>>) target(%43 : memref<128xf32, #tpu.memory_space<vmem>>) target_semaphore(%45 : memref<!tpu.dma_semaphore, #tpu.memory_space<semaphore_mem>>)
    %c5_i32 = arith.constant 5 : i32
    %46 = arith.addi %0, %c5_i32 : i32
    %47 = arith.index_cast %46 : i32 to index
    %48 = memref.load %arg1[%47] : memref<16xi32, #tpu.memory_space<smem>>
    %c5_i32_20 = arith.constant 5 : i32
    %c5_i32_21 = arith.constant 5 : i32
    %c0_i32_22 = arith.constant 0 : i32
    %49 = tpu.memref_slice %arg2[%48, %c0_i32_22] : memref<100x128xf32, #tpu.memory_space<any>> -> memref<1x128xf32, #tpu.memory_space<any>>
    %50 = tpu.memref_squeeze %49 : memref<1x128xf32, #tpu.memory_space<any>> -> memref<128xf32, #tpu.memory_space<any>>
    %c0_i32_23 = arith.constant 0 : i32
    %51 = tpu.memref_slice %arg4[%c5_i32_20, %c0_i32_23] : memref<16x128xf32, #tpu.memory_space<vmem>> -> memref<1x128xf32, #tpu.memory_space<vmem>>
    %52 = tpu.memref_squeeze %51 : memref<1x128xf32, #tpu.memory_space<vmem>> -> memref<128xf32, #tpu.memory_space<vmem>>
    %53 = tpu.memref_slice %arg5[%c5_i32_21] : memref<16x!tpu.dma_semaphore, #tpu.memory_space<semaphore_mem>> -> memref<1x!tpu.dma_semaphore, #tpu.memory_space<semaphore_mem>>
    %54 = tpu.memref_squeeze %53 : memref<1x!tpu.dma_semaphore, #tpu.memory_space<semaphore_mem>> -> memref<!tpu.dma_semaphore, #tpu.memory_space<semaphore_mem>>
    tpu.enqueue_dma source(%50 : memref<128xf32, #tpu.memory_space<any>>) target(%52 : memref<128xf32, #tpu.memory_space<vmem>>) target_semaphore(%54 : memref<!tpu.dma_semaphore, #tpu.memory_space<semaphore_mem>>)
    %c6_i32 = arith.constant 6 : i32
    %55 = arith.addi %0, %c6_i32 : i32
    %56 = arith.index_cast %55 : i32 to index
    %57 = memref.load %arg1[%56] : memref<16xi32, #tpu.memory_space<smem>>
    %c6_i32_24 = arith.constant 6 : i32
    %c6_i32_25 = arith.constant 6 : i32
    %c0_i32_26 = arith.constant 0 : i32
    %58 = tpu.memref_slice %arg2[%57, %c0_i32_26] : memref<100x128xf32, #tpu.memory_space<any>> -> memref<1x128xf32, #tpu.memory_space<any>>
    %59 = tpu.memref_squeeze %58 : memref<1x128xf32, #tpu.memory_space<any>> -> memref<128xf32, #tpu.memory_space<any>>
    %c0_i32_27 = arith.constant 0 : i32
    %60 = tpu.memref_slice %arg4[%c6_i32_24, %c0_i32_27] : memref<16x128xf32, #tpu.memory_space<vmem>> -> memref<1x128xf32, #tpu.memory_space<vmem>>
    %61 = tpu.memref_squeeze %60 : memref<1x128xf32, #tpu.memory_space<vmem>> -> memref<128xf32, #tpu.memory_space<vmem>>
    %62 = tpu.memref_slice %arg5[%c6_i32_25] : memref<16x!tpu.dma_semaphore, #tpu.memory_space<semaphore_mem>> -> memref<1x!tpu.dma_semaphore, #tpu.memory_space<semaphore_mem>>
    %63 = tpu.memref_squeeze %62 : memref<1x!tpu.dma_semaphore, #tpu.memory_space<semaphore_mem>> -> memref<!tpu.dma_semaphore, #tpu.memory_space<semaphore_mem>>
    tpu.enqueue_dma source(%59 : memref<128xf32, #tpu.memory_space<any>>) target(%61 : memref<128xf32, #tpu.memory_space<vmem>>) target_semaphore(%63 : memref<!tpu.dma_semaphore, #tpu.memory_space<semaphore_mem>>)
    %c7_i32 = arith.constant 7 : i32
    %64 = arith.addi %0, %c7_i32 : i32
    %65 = arith.index_cast %64 : i32 to index
    %66 = memref.load %arg1[%65] : memref<16xi32, #tpu.memory_space<smem>>
    %c7_i32_28 = arith.constant 7 : i32
    %c7_i32_29 = arith.constant 7 : i32
    %c0_i32_30 = arith.constant 0 : i32
    %67 = tpu.memref_slice %arg2[%66, %c0_i32_30] : memref<100x128xf32, #tpu.memory_space<any>> -> memref<1x128xf32, #tpu.memory_space<any>>
    %68 = tpu.memref_squeeze %67 : memref<1x128xf32, #tpu.memory_space<any>> -> memref<128xf32, #tpu.memory_space<any>>
    %c0_i32_31 = arith.constant 0 : i32
    %69 = tpu.memref_slice %arg4[%c7_i32_28, %c0_i32_31] : memref<16x128xf32, #tpu.memory_space<vmem>> -> memref<1x128xf32, #tpu.memory_space<vmem>>
    %70 = tpu.memref_squeeze %69 : memref<1x128xf32, #tpu.memory_space<vmem>> -> memref<128xf32, #tpu.memory_space<vmem>>
    %71 = tpu.memref_slice %arg5[%c7_i32_29] : memref<16x!tpu.dma_semaphore, #tpu.memory_space<semaphore_mem>> -> memref<1x!tpu.dma_semaphore, #tpu.memory_space<semaphore_mem>>
    %72 = tpu.memref_squeeze %71 : memref<1x!tpu.dma_semaphore, #tpu.memory_space<semaphore_mem>> -> memref<!tpu.dma_semaphore, #tpu.memory_space<semaphore_mem>>
    tpu.enqueue_dma source(%68 : memref<128xf32, #tpu.memory_space<any>>) target(%70 : memref<128xf32, #tpu.memory_space<vmem>>) target_semaphore(%72 : memref<!tpu.dma_semaphore, #tpu.memory_space<semaphore_mem>>)
    %c8_i32 = arith.constant 8 : i32
    %73 = arith.addi %0, %c8_i32 : i32
    %74 = arith.index_cast %73 : i32 to index
    %75 = memref.load %arg1[%74] : memref<16xi32, #tpu.memory_space<smem>>
    %c8_i32_32 = arith.constant 8 : i32
    %c8_i32_33 = arith.constant 8 : i32
    %c0_i32_34 = arith.constant 0 : i32
    %76 = tpu.memref_slice %arg2[%75, %c0_i32_34] : memref<100x128xf32, #tpu.memory_space<any>> -> memref<1x128xf32, #tpu.memory_space<any>>
    %77 = tpu.memref_squeeze %76 : memref<1x128xf32, #tpu.memory_space<any>> -> memref<128xf32, #tpu.memory_space<any>>
    %c0_i32_35 = arith.constant 0 : i32
    %78 = tpu.memref_slice %arg4[%c8_i32_32, %c0_i32_35] : memref<16x128xf32, #tpu.memory_space<vmem>> -> memref<1x128xf32, #tpu.memory_space<vmem>>
    %79 = tpu.memref_squeeze %78 : memref<1x128xf32, #tpu.memory_space<vmem>> -> memref<128xf32, #tpu.memory_space<vmem>>
    %80 = tpu.memref_slice %arg5[%c8_i32_33] : memref<16x!tpu.dma_semaphore, #tpu.memory_space<semaphore_mem>> -> memref<1x!tpu.dma_semaphore, #tpu.memory_space<semaphore_mem>>
    %81 = tpu.memref_squeeze %80 : memref<1x!tpu.dma_semaphore, #tpu.memory_space<semaphore_mem>> -> memref<!tpu.dma_semaphore, #tpu.memory_space<semaphore_mem>>
    tpu.enqueue_dma source(%77 : memref<128xf32, #tpu.memory_space<any>>) target(%79 : memref<128xf32, #tpu.memory_space<vmem>>) target_semaphore(%81 : memref<!tpu.dma_semaphore, #tpu.memory_space<semaphore_mem>>)
    %c9_i32 = arith.constant 9 : i32
    %82 = arith.addi %0, %c9_i32 : i32
    %83 = arith.index_cast %82 : i32 to index
    %84 = memref.load %arg1[%83] : memref<16xi32, #tpu.memory_space<smem>>
    %c9_i32_36 = arith.constant 9 : i32
    %c9_i32_37 = arith.constant 9 : i32
    %c0_i32_38 = arith.constant 0 : i32
    %85 = tpu.memref_slice %arg2[%84, %c0_i32_38] : memref<100x128xf32, #tpu.memory_space<any>> -> memref<1x128xf32, #tpu.memory_space<any>>
    %86 = tpu.memref_squeeze %85 : memref<1x128xf32, #tpu.memory_space<any>> -> memref<128xf32, #tpu.memory_space<any>>
    %c0_i32_39 = arith.constant 0 : i32
    %87 = tpu.memref_slice %arg4[%c9_i32_36, %c0_i32_39] : memref<16x128xf32, #tpu.memory_space<vmem>> -> memref<1x128xf32, #tpu.memory_space<vmem>>
    %88 = tpu.memref_squeeze %87 : memref<1x128xf32, #tpu.memory_space<vmem>> -> memref<128xf32, #tpu.memory_space<vmem>>
    %89 = tpu.memref_slice %arg5[%c9_i32_37] : memref<16x!tpu.dma_semaphore, #tpu.memory_space<semaphore_mem>> -> memref<1x!tpu.dma_semaphore, #tpu.memory_space<semaphore_mem>>
    %90 = tpu.memref_squeeze %89 : memref<1x!tpu.dma_semaphore, #tpu.memory_space<semaphore_mem>> -> memref<!tpu.dma_semaphore, #tpu.memory_space<semaphore_mem>>
    tpu.enqueue_dma source(%86 : memref<128xf32, #tpu.memory_space<any>>) target(%88 : memref<128xf32, #tpu.memory_space<vmem>>) target_semaphore(%90 : memref<!tpu.dma_semaphore, #tpu.memory_space<semaphore_mem>>)
    %c10_i32 = arith.constant 10 : i32
    %91 = arith.addi %0, %c10_i32 : i32
    %92 = arith.index_cast %91 : i32 to index
    %93 = memref.load %arg1[%92] : memref<16xi32, #tpu.memory_space<smem>>
    %c10_i32_40 = arith.constant 10 : i32
    %c10_i32_41 = arith.constant 10 : i32
    %c0_i32_42 = arith.constant 0 : i32
    %94 = tpu.memref_slice %arg2[%93, %c0_i32_42] : memref<100x128xf32, #tpu.memory_space<any>> -> memref<1x128xf32, #tpu.memory_space<any>>
    %95 = tpu.memref_squeeze %94 : memref<1x128xf32, #tpu.memory_space<any>> -> memref<128xf32, #tpu.memory_space<any>>
    %c0_i32_43 = arith.constant 0 : i32
    %96 = tpu.memref_slice %arg4[%c10_i32_40, %c0_i32_43] : memref<16x128xf32, #tpu.memory_space<vmem>> -> memref<1x128xf32, #tpu.memory_space<vmem>>
    %97 = tpu.memref_squeeze %96 : memref<1x128xf32, #tpu.memory_space<vmem>> -> memref<128xf32, #tpu.memory_space<vmem>>
    %98 = tpu.memref_slice %arg5[%c10_i32_41] : memref<16x!tpu.dma_semaphore, #tpu.memory_space<semaphore_mem>> -> memref<1x!tpu.dma_semaphore, #tpu.memory_space<semaphore_mem>>
    %99 = tpu.memref_squeeze %98 : memref<1x!tpu.dma_semaphore, #tpu.memory_space<semaphore_mem>> -> memref<!tpu.dma_semaphore, #tpu.memory_space<semaphore_mem>>
    tpu.enqueue_dma source(%95 : memref<128xf32, #tpu.memory_space<any>>) target(%97 : memref<128xf32, #tpu.memory_space<vmem>>) target_semaphore(%99 : memref<!tpu.dma_semaphore, #tpu.memory_space<semaphore_mem>>)
    %c11_i32 = arith.constant 11 : i32
    %100 = arith.addi %0, %c11_i32 : i32
    %101 = arith.index_cast %100 : i32 to index
    %102 = memref.load %arg1[%101] : memref<16xi32, #tpu.memory_space<smem>>
    %c11_i32_44 = arith.constant 11 : i32
    %c11_i32_45 = arith.constant 11 : i32
    %c0_i32_46 = arith.constant 0 : i32
    %103 = tpu.memref_slice %arg2[%102, %c0_i32_46] : memref<100x128xf32, #tpu.memory_space<any>> -> memref<1x128xf32, #tpu.memory_space<any>>
    %104 = tpu.memref_squeeze %103 : memref<1x128xf32, #tpu.memory_space<any>> -> memref<128xf32, #tpu.memory_space<any>>
    %c0_i32_47 = arith.constant 0 : i32
    %105 = tpu.memref_slice %arg4[%c11_i32_44, %c0_i32_47] : memref<16x128xf32, #tpu.memory_space<vmem>> -> memref<1x128xf32, #tpu.memory_space<vmem>>
    %106 = tpu.memref_squeeze %105 : memref<1x128xf32, #tpu.memory_space<vmem>> -> memref<128xf32, #tpu.memory_space<vmem>>
    %107 = tpu.memref_slice %arg5[%c11_i32_45] : memref<16x!tpu.dma_semaphore, #tpu.memory_space<semaphore_mem>> -> memref<1x!tpu.dma_semaphore, #tpu.memory_space<semaphore_mem>>
    %108 = tpu.memref_squeeze %107 : memref<1x!tpu.dma_semaphore, #tpu.memory_space<semaphore_mem>> -> memref<!tpu.dma_semaphore, #tpu.memory_space<semaphore_mem>>
    tpu.enqueue_dma source(%104 : memref<128xf32, #tpu.memory_space<any>>) target(%106 : memref<128xf32, #tpu.memory_space<vmem>>) target_semaphore(%108 : memref<!tpu.dma_semaphore, #tpu.memory_space<semaphore_mem>>)
    %c12_i32 = arith.constant 12 : i32
    %109 = arith.addi %0, %c12_i32 : i32
    %110 = arith.index_cast %109 : i32 to index
    %111 = memref.load %arg1[%110] : memref<16xi32, #tpu.memory_space<smem>>
    %c12_i32_48 = arith.constant 12 : i32
    %c12_i32_49 = arith.constant 12 : i32
    %c0_i32_50 = arith.constant 0 : i32
    %112 = tpu.memref_slice %arg2[%111, %c0_i32_50] : memref<100x128xf32, #tpu.memory_space<any>> -> memref<1x128xf32, #tpu.memory_space<any>>
    %113 = tpu.memref_squeeze %112 : memref<1x128xf32, #tpu.memory_space<any>> -> memref<128xf32, #tpu.memory_space<any>>
    %c0_i32_51 = arith.constant 0 : i32
    %114 = tpu.memref_slice %arg4[%c12_i32_48, %c0_i32_51] : memref<16x128xf32, #tpu.memory_space<vmem>> -> memref<1x128xf32, #tpu.memory_space<vmem>>
    %115 = tpu.memref_squeeze %114 : memref<1x128xf32, #tpu.memory_space<vmem>> -> memref<128xf32, #tpu.memory_space<vmem>>
    %116 = tpu.memref_slice %arg5[%c12_i32_49] : memref<16x!tpu.dma_semaphore, #tpu.memory_space<semaphore_mem>> -> memref<1x!tpu.dma_semaphore, #tpu.memory_space<semaphore_mem>>
    %117 = tpu.memref_squeeze %116 : memref<1x!tpu.dma_semaphore, #tpu.memory_space<semaphore_mem>> -> memref<!tpu.dma_semaphore, #tpu.memory_space<semaphore_mem>>
    tpu.enqueue_dma source(%113 : memref<128xf32, #tpu.memory_space<any>>) target(%115 : memref<128xf32, #tpu.memory_space<vmem>>) target_semaphore(%117 : memref<!tpu.dma_semaphore, #tpu.memory_space<semaphore_mem>>)
    %c13_i32 = arith.constant 13 : i32
    %118 = arith.addi %0, %c13_i32 : i32
    %119 = arith.index_cast %118 : i32 to index
    %120 = memref.load %arg1[%119] : memref<16xi32, #tpu.memory_space<smem>>
    %c13_i32_52 = arith.constant 13 : i32
    %c13_i32_53 = arith.constant 13 : i32
    %c0_i32_54 = arith.constant 0 : i32
    %121 = tpu.memref_slice %arg2[%120, %c0_i32_54] : memref<100x128xf32, #tpu.memory_space<any>> -> memref<1x128xf32, #tpu.memory_space<any>>
    %122 = tpu.memref_squeeze %121 : memref<1x128xf32, #tpu.memory_space<any>> -> memref<128xf32, #tpu.memory_space<any>>
    %c0_i32_55 = arith.constant 0 : i32
    %123 = tpu.memref_slice %arg4[%c13_i32_52, %c0_i32_55] : memref<16x128xf32, #tpu.memory_space<vmem>> -> memref<1x128xf32, #tpu.memory_space<vmem>>
    %124 = tpu.memref_squeeze %123 : memref<1x128xf32, #tpu.memory_space<vmem>> -> memref<128xf32, #tpu.memory_space<vmem>>
    %125 = tpu.memref_slice %arg5[%c13_i32_53] : memref<16x!tpu.dma_semaphore, #tpu.memory_space<semaphore_mem>> -> memref<1x!tpu.dma_semaphore, #tpu.memory_space<semaphore_mem>>
    %126 = tpu.memref_squeeze %125 : memref<1x!tpu.dma_semaphore, #tpu.memory_space<semaphore_mem>> -> memref<!tpu.dma_semaphore, #tpu.memory_space<semaphore_mem>>
    tpu.enqueue_dma source(%122 : memref<128xf32, #tpu.memory_space<any>>) target(%124 : memref<128xf32, #tpu.memory_space<vmem>>) target_semaphore(%126 : memref<!tpu.dma_semaphore, #tpu.memory_space<semaphore_mem>>)
    %c14_i32 = arith.constant 14 : i32
    %127 = arith.addi %0, %c14_i32 : i32
    %128 = arith.index_cast %127 : i32 to index
    %129 = memref.load %arg1[%128] : memref<16xi32, #tpu.memory_space<smem>>
    %c14_i32_56 = arith.constant 14 : i32
    %c14_i32_57 = arith.constant 14 : i32
    %c0_i32_58 = arith.constant 0 : i32
    %130 = tpu.memref_slice %arg2[%129, %c0_i32_58] : memref<100x128xf32, #tpu.memory_space<any>> -> memref<1x128xf32, #tpu.memory_space<any>>
    %131 = tpu.memref_squeeze %130 : memref<1x128xf32, #tpu.memory_space<any>> -> memref<128xf32, #tpu.memory_space<any>>
    %c0_i32_59 = arith.constant 0 : i32
    %132 = tpu.memref_slice %arg4[%c14_i32_56, %c0_i32_59] : memref<16x128xf32, #tpu.memory_space<vmem>> -> memref<1x128xf32, #tpu.memory_space<vmem>>
    %133 = tpu.memref_squeeze %132 : memref<1x128xf32, #tpu.memory_space<vmem>> -> memref<128xf32, #tpu.memory_space<vmem>>
    %134 = tpu.memref_slice %arg5[%c14_i32_57] : memref<16x!tpu.dma_semaphore, #tpu.memory_space<semaphore_mem>> -> memref<1x!tpu.dma_semaphore, #tpu.memory_space<semaphore_mem>>
    %135 = tpu.memref_squeeze %134 : memref<1x!tpu.dma_semaphore, #tpu.memory_space<semaphore_mem>> -> memref<!tpu.dma_semaphore, #tpu.memory_space<semaphore_mem>>
    tpu.enqueue_dma source(%131 : memref<128xf32, #tpu.memory_space<any>>) target(%133 : memref<128xf32, #tpu.memory_space<vmem>>) target_semaphore(%135 : memref<!tpu.dma_semaphore, #tpu.memory_space<semaphore_mem>>)
    %c15_i32 = arith.constant 15 : i32
    %136 = arith.addi %0, %c15_i32 : i32
    %137 = arith.index_cast %136 : i32 to index
    %138 = memref.load %arg1[%137] : memref<16xi32, #tpu.memory_space<smem>>
    %c15_i32_60 = arith.constant 15 : i32
    %c15_i32_61 = arith.constant 15 : i32
    %c0_i32_62 = arith.constant 0 : i32
    %139 = tpu.memref_slice %arg2[%138, %c0_i32_62] : memref<100x128xf32, #tpu.memory_space<any>> -> memref<1x128xf32, #tpu.memory_space<any>>
    %140 = tpu.memref_squeeze %139 : memref<1x128xf32, #tpu.memory_space<any>> -> memref<128xf32, #tpu.memory_space<any>>
    %c0_i32_63 = arith.constant 0 : i32
    %141 = tpu.memref_slice %arg4[%c15_i32_60, %c0_i32_63] : memref<16x128xf32, #tpu.memory_space<vmem>> -> memref<1x128xf32, #tpu.memory_space<vmem>>
    %142 = tpu.memref_squeeze %141 : memref<1x128xf32, #tpu.memory_space<vmem>> -> memref<128xf32, #tpu.memory_space<vmem>>
    %143 = tpu.memref_slice %arg5[%c15_i32_61] : memref<16x!tpu.dma_semaphore, #tpu.memory_space<semaphore_mem>> -> memref<1x!tpu.dma_semaphore, #tpu.memory_space<semaphore_mem>>
    %144 = tpu.memref_squeeze %143 : memref<1x!tpu.dma_semaphore, #tpu.memory_space<semaphore_mem>> -> memref<!tpu.dma_semaphore, #tpu.memory_space<semaphore_mem>>
    tpu.enqueue_dma source(%140 : memref<128xf32, #tpu.memory_space<any>>) target(%142 : memref<128xf32, #tpu.memory_space<vmem>>) target_semaphore(%144 : memref<!tpu.dma_semaphore, #tpu.memory_space<semaphore_mem>>)
    %c0_i32_64 = arith.constant 0 : i32
    %c0_i32_65 = arith.constant 0 : i32
    %c0_i32_66 = arith.constant 0 : i32
    %145 = tpu.memref_slice %arg2[%3, %c0_i32_66] : memref<100x128xf32, #tpu.memory_space<any>> -> memref<1x128xf32, #tpu.memory_space<any>>
    %146 = tpu.memref_squeeze %145 : memref<1x128xf32, #tpu.memory_space<any>> -> memref<128xf32, #tpu.memory_space<any>>
    %c0_i32_67 = arith.constant 0 : i32
    %147 = tpu.memref_slice %arg4[%c0_i32_64, %c0_i32_67] : memref<16x128xf32, #tpu.memory_space<vmem>> -> memref<1x128xf32, #tpu.memory_space<vmem>>
    %148 = tpu.memref_squeeze %147 : memref<1x128xf32, #tpu.memory_space<vmem>> -> memref<128xf32, #tpu.memory_space<vmem>>
    %149 = tpu.memref_slice %arg5[%c0_i32_65] : memref<16x!tpu.dma_semaphore, #tpu.memory_space<semaphore_mem>> -> memref<1x!tpu.dma_semaphore, #tpu.memory_space<semaphore_mem>>
    %150 = tpu.memref_squeeze %149 : memref<1x!tpu.dma_semaphore, #tpu.memory_space<semaphore_mem>> -> memref<!tpu.dma_semaphore, #tpu.memory_space<semaphore_mem>>
    tpu.wait_dma2 semaphore(%150 : memref<!tpu.dma_semaphore, #tpu.memory_space<semaphore_mem>>) src(%146 : memref<128xf32, #tpu.memory_space<any>>) dst(%148 : memref<128xf32, #tpu.memory_space<vmem>>)
    %c1_i32_68 = arith.constant 1 : i32
    %c1_i32_69 = arith.constant 1 : i32
    %c0_i32_70 = arith.constant 0 : i32
    %151 = tpu.memref_slice %arg2[%12, %c0_i32_70] : memref<100x128xf32, #tpu.memory_space<any>> -> memref<1x128xf32, #tpu.memory_space<any>>
    %152 = tpu.memref_squeeze %151 : memref<1x128xf32, #tpu.memory_space<any>> -> memref<128xf32, #tpu.memory_space<any>>
    %c0_i32_71 = arith.constant 0 : i32
    %153 = tpu.memref_slice %arg4[%c1_i32_68, %c0_i32_71] : memref<16x128xf32, #tpu.memory_space<vmem>> -> memref<1x128xf32, #tpu.memory_space<vmem>>
    %154 = tpu.memref_squeeze %153 : memref<1x128xf32, #tpu.memory_space<vmem>> -> memref<128xf32, #tpu.memory_space<vmem>>
    %155 = tpu.memref_slice %arg5[%c1_i32_69] : memref<16x!tpu.dma_semaphore, #tpu.memory_space<semaphore_mem>> -> memref<1x!tpu.dma_semaphore, #tpu.memory_space<semaphore_mem>>
    %156 = tpu.memref_squeeze %155 : memref<1x!tpu.dma_semaphore, #tpu.memory_space<semaphore_mem>> -> memref<!tpu.dma_semaphore, #tpu.memory_space<semaphore_mem>>
    tpu.wait_dma2 semaphore(%156 : memref<!tpu.dma_semaphore, #tpu.memory_space<semaphore_mem>>) src(%152 : memref<128xf32, #tpu.memory_space<any>>) dst(%154 : memref<128xf32, #tpu.memory_space<vmem>>)
    %c2_i32_72 = arith.constant 2 : i32
    %c2_i32_73 = arith.constant 2 : i32
    %c0_i32_74 = arith.constant 0 : i32
    %157 = tpu.memref_slice %arg2[%21, %c0_i32_74] : memref<100x128xf32, #tpu.memory_space<any>> -> memref<1x128xf32, #tpu.memory_space<any>>
    %158 = tpu.memref_squeeze %157 : memref<1x128xf32, #tpu.memory_space<any>> -> memref<128xf32, #tpu.memory_space<any>>
    %c0_i32_75 = arith.constant 0 : i32
    %159 = tpu.memref_slice %arg4[%c2_i32_72, %c0_i32_75] : memref<16x128xf32, #tpu.memory_space<vmem>> -> memref<1x128xf32, #tpu.memory_space<vmem>>
    %160 = tpu.memref_squeeze %159 : memref<1x128xf32, #tpu.memory_space<vmem>> -> memref<128xf32, #tpu.memory_space<vmem>>
    %161 = tpu.memref_slice %arg5[%c2_i32_73] : memref<16x!tpu.dma_semaphore, #tpu.memory_space<semaphore_mem>> -> memref<1x!tpu.dma_semaphore, #tpu.memory_space<semaphore_mem>>
    %162 = tpu.memref_squeeze %161 : memref<1x!tpu.dma_semaphore, #tpu.memory_space<semaphore_mem>> -> memref<!tpu.dma_semaphore, #tpu.memory_space<semaphore_mem>>
    tpu.wait_dma2 semaphore(%162 : memref<!tpu.dma_semaphore, #tpu.memory_space<semaphore_mem>>) src(%158 : memref<128xf32, #tpu.memory_space<any>>) dst(%160 : memref<128xf32, #tpu.memory_space<vmem>>)
    %c3_i32_76 = arith.constant 3 : i32
    %c3_i32_77 = arith.constant 3 : i32
    %c0_i32_78 = arith.constant 0 : i32
    %163 = tpu.memref_slice %arg2[%30, %c0_i32_78] : memref<100x128xf32, #tpu.memory_space<any>> -> memref<1x128xf32, #tpu.memory_space<any>>
    %164 = tpu.memref_squeeze %163 : memref<1x128xf32, #tpu.memory_space<any>> -> memref<128xf32, #tpu.memory_space<any>>
    %c0_i32_79 = arith.constant 0 : i32
    %165 = tpu.memref_slice %arg4[%c3_i32_76, %c0_i32_79] : memref<16x128xf32, #tpu.memory_space<vmem>> -> memref<1x128xf32, #tpu.memory_space<vmem>>
    %166 = tpu.memref_squeeze %165 : memref<1x128xf32, #tpu.memory_space<vmem>> -> memref<128xf32, #tpu.memory_space<vmem>>
    %167 = tpu.memref_slice %arg5[%c3_i32_77] : memref<16x!tpu.dma_semaphore, #tpu.memory_space<semaphore_mem>> -> memref<1x!tpu.dma_semaphore, #tpu.memory_space<semaphore_mem>>
    %168 = tpu.memref_squeeze %167 : memref<1x!tpu.dma_semaphore, #tpu.memory_space<semaphore_mem>> -> memref<!tpu.dma_semaphore, #tpu.memory_space<semaphore_mem>>
    tpu.wait_dma2 semaphore(%168 : memref<!tpu.dma_semaphore, #tpu.memory_space<semaphore_mem>>) src(%164 : memref<128xf32, #tpu.memory_space<any>>) dst(%166 : memref<128xf32, #tpu.memory_space<vmem>>)
    %c4_i32_80 = arith.constant 4 : i32
    %c4_i32_81 = arith.constant 4 : i32
    %c0_i32_82 = arith.constant 0 : i32
    %169 = tpu.memref_slice %arg2[%39, %c0_i32_82] : memref<100x128xf32, #tpu.memory_space<any>> -> memref<1x128xf32, #tpu.memory_space<any>>
    %170 = tpu.memref_squeeze %169 : memref<1x128xf32, #tpu.memory_space<any>> -> memref<128xf32, #tpu.memory_space<any>>
    %c0_i32_83 = arith.constant 0 : i32
    %171 = tpu.memref_slice %arg4[%c4_i32_80, %c0_i32_83] : memref<16x128xf32, #tpu.memory_space<vmem>> -> memref<1x128xf32, #tpu.memory_space<vmem>>
    %172 = tpu.memref_squeeze %171 : memref<1x128xf32, #tpu.memory_space<vmem>> -> memref<128xf32, #tpu.memory_space<vmem>>
    %173 = tpu.memref_slice %arg5[%c4_i32_81] : memref<16x!tpu.dma_semaphore, #tpu.memory_space<semaphore_mem>> -> memref<1x!tpu.dma_semaphore, #tpu.memory_space<semaphore_mem>>
    %174 = tpu.memref_squeeze %173 : memref<1x!tpu.dma_semaphore, #tpu.memory_space<semaphore_mem>> -> memref<!tpu.dma_semaphore, #tpu.memory_space<semaphore_mem>>
    tpu.wait_dma2 semaphore(%174 : memref<!tpu.dma_semaphore, #tpu.memory_space<semaphore_mem>>) src(%170 : memref<128xf32, #tpu.memory_space<any>>) dst(%172 : memref<128xf32, #tpu.memory_space<vmem>>)
    %c5_i32_84 = arith.constant 5 : i32
    %c5_i32_85 = arith.constant 5 : i32
    %c0_i32_86 = arith.constant 0 : i32
    %175 = tpu.memref_slice %arg2[%48, %c0_i32_86] : memref<100x128xf32, #tpu.memory_space<any>> -> memref<1x128xf32, #tpu.memory_space<any>>
    %176 = tpu.memref_squeeze %175 : memref<1x128xf32, #tpu.memory_space<any>> -> memref<128xf32, #tpu.memory_space<any>>
    %c0_i32_87 = arith.constant 0 : i32
    %177 = tpu.memref_slice %arg4[%c5_i32_84, %c0_i32_87] : memref<16x128xf32, #tpu.memory_space<vmem>> -> memref<1x128xf32, #tpu.memory_space<vmem>>
    %178 = tpu.memref_squeeze %177 : memref<1x128xf32, #tpu.memory_space<vmem>> -> memref<128xf32, #tpu.memory_space<vmem>>
    %179 = tpu.memref_slice %arg5[%c5_i32_85] : memref<16x!tpu.dma_semaphore, #tpu.memory_space<semaphore_mem>> -> memref<1x!tpu.dma_semaphore, #tpu.memory_space<semaphore_mem>>
    %180 = tpu.memref_squeeze %179 : memref<1x!tpu.dma_semaphore, #tpu.memory_space<semaphore_mem>> -> memref<!tpu.dma_semaphore, #tpu.memory_space<semaphore_mem>>
    tpu.wait_dma2 semaphore(%180 : memref<!tpu.dma_semaphore, #tpu.memory_space<semaphore_mem>>) src(%176 : memref<128xf32, #tpu.memory_space<any>>) dst(%178 : memref<128xf32, #tpu.memory_space<vmem>>)
    %c6_i32_88 = arith.constant 6 : i32
    %c6_i32_89 = arith.constant 6 : i32
    %c0_i32_90 = arith.constant 0 : i32
    %181 = tpu.memref_slice %arg2[%57, %c0_i32_90] : memref<100x128xf32, #tpu.memory_space<any>> -> memref<1x128xf32, #tpu.memory_space<any>>
    %182 = tpu.memref_squeeze %181 : memref<1x128xf32, #tpu.memory_space<any>> -> memref<128xf32, #tpu.memory_space<any>>
    %c0_i32_91 = arith.constant 0 : i32
    %183 = tpu.memref_slice %arg4[%c6_i32_88, %c0_i32_91] : memref<16x128xf32, #tpu.memory_space<vmem>> -> memref<1x128xf32, #tpu.memory_space<vmem>>
    %184 = tpu.memref_squeeze %183 : memref<1x128xf32, #tpu.memory_space<vmem>> -> memref<128xf32, #tpu.memory_space<vmem>>
    %185 = tpu.memref_slice %arg5[%c6_i32_89] : memref<16x!tpu.dma_semaphore, #tpu.memory_space<semaphore_mem>> -> memref<1x!tpu.dma_semaphore, #tpu.memory_space<semaphore_mem>>
    %186 = tpu.memref_squeeze %185 : memref<1x!tpu.dma_semaphore, #tpu.memory_space<semaphore_mem>> -> memref<!tpu.dma_semaphore, #tpu.memory_space<semaphore_mem>>
    tpu.wait_dma2 semaphore(%186 : memref<!tpu.dma_semaphore, #tpu.memory_space<semaphore_mem>>) src(%182 : memref<128xf32, #tpu.memory_space<any>>) dst(%184 : memref<128xf32, #tpu.memory_space<vmem>>)
    %c7_i32_92 = arith.constant 7 : i32
    %c7_i32_93 = arith.constant 7 : i32
    %c0_i32_94 = arith.constant 0 : i32
    %187 = tpu.memref_slice %arg2[%66, %c0_i32_94] : memref<100x128xf32, #tpu.memory_space<any>> -> memref<1x128xf32, #tpu.memory_space<any>>
    %188 = tpu.memref_squeeze %187 : memref<1x128xf32, #tpu.memory_space<any>> -> memref<128xf32, #tpu.memory_space<any>>
    %c0_i32_95 = arith.constant 0 : i32
    %189 = tpu.memref_slice %arg4[%c7_i32_92, %c0_i32_95] : memref<16x128xf32, #tpu.memory_space<vmem>> -> memref<1x128xf32, #tpu.memory_space<vmem>>
    %190 = tpu.memref_squeeze %189 : memref<1x128xf32, #tpu.memory_space<vmem>> -> memref<128xf32, #tpu.memory_space<vmem>>
    %191 = tpu.memref_slice %arg5[%c7_i32_93] : memref<16x!tpu.dma_semaphore, #tpu.memory_space<semaphore_mem>> -> memref<1x!tpu.dma_semaphore, #tpu.memory_space<semaphore_mem>>
    %192 = tpu.memref_squeeze %191 : memref<1x!tpu.dma_semaphore, #tpu.memory_space<semaphore_mem>> -> memref<!tpu.dma_semaphore, #tpu.memory_space<semaphore_mem>>
    tpu.wait_dma2 semaphore(%192 : memref<!tpu.dma_semaphore, #tpu.memory_space<semaphore_mem>>) src(%188 : memref<128xf32, #tpu.memory_space<any>>) dst(%190 : memref<128xf32, #tpu.memory_space<vmem>>)
    %c8_i32_96 = arith.constant 8 : i32
    %c8_i32_97 = arith.constant 8 : i32
    %c0_i32_98 = arith.constant 0 : i32
    %193 = tpu.memref_slice %arg2[%75, %c0_i32_98] : memref<100x128xf32, #tpu.memory_space<any>> -> memref<1x128xf32, #tpu.memory_space<any>>
    %194 = tpu.memref_squeeze %193 : memref<1x128xf32, #tpu.memory_space<any>> -> memref<128xf32, #tpu.memory_space<any>>
    %c0_i32_99 = arith.constant 0 : i32
    %195 = tpu.memref_slice %arg4[%c8_i32_96, %c0_i32_99] : memref<16x128xf32, #tpu.memory_space<vmem>> -> memref<1x128xf32, #tpu.memory_space<vmem>>
    %196 = tpu.memref_squeeze %195 : memref<1x128xf32, #tpu.memory_space<vmem>> -> memref<128xf32, #tpu.memory_space<vmem>>
    %197 = tpu.memref_slice %arg5[%c8_i32_97] : memref<16x!tpu.dma_semaphore, #tpu.memory_space<semaphore_mem>> -> memref<1x!tpu.dma_semaphore, #tpu.memory_space<semaphore_mem>>
    %198 = tpu.memref_squeeze %197 : memref<1x!tpu.dma_semaphore, #tpu.memory_space<semaphore_mem>> -> memref<!tpu.dma_semaphore, #tpu.memory_space<semaphore_mem>>
    tpu.wait_dma2 semaphore(%198 : memref<!tpu.dma_semaphore, #tpu.memory_space<semaphore_mem>>) src(%194 : memref<128xf32, #tpu.memory_space<any>>) dst(%196 : memref<128xf32, #tpu.memory_space<vmem>>)
    %c9_i32_100 = arith.constant 9 : i32
    %c9_i32_101 = arith.constant 9 : i32
    %c0_i32_102 = arith.constant 0 : i32
    %199 = tpu.memref_slice %arg2[%84, %c0_i32_102] : memref<100x128xf32, #tpu.memory_space<any>> -> memref<1x128xf32, #tpu.memory_space<any>>
    %200 = tpu.memref_squeeze %199 : memref<1x128xf32, #tpu.memory_space<any>> -> memref<128xf32, #tpu.memory_space<any>>
    %c0_i32_103 = arith.constant 0 : i32
    %201 = tpu.memref_slice %arg4[%c9_i32_100, %c0_i32_103] : memref<16x128xf32, #tpu.memory_space<vmem>> -> memref<1x128xf32, #tpu.memory_space<vmem>>
    %202 = tpu.memref_squeeze %201 : memref<1x128xf32, #tpu.memory_space<vmem>> -> memref<128xf32, #tpu.memory_space<vmem>>
    %203 = tpu.memref_slice %arg5[%c9_i32_101] : memref<16x!tpu.dma_semaphore, #tpu.memory_space<semaphore_mem>> -> memref<1x!tpu.dma_semaphore, #tpu.memory_space<semaphore_mem>>
    %204 = tpu.memref_squeeze %203 : memref<1x!tpu.dma_semaphore, #tpu.memory_space<semaphore_mem>> -> memref<!tpu.dma_semaphore, #tpu.memory_space<semaphore_mem>>
    tpu.wait_dma2 semaphore(%204 : memref<!tpu.dma_semaphore, #tpu.memory_space<semaphore_mem>>) src(%200 : memref<128xf32, #tpu.memory_space<any>>) dst(%202 : memref<128xf32, #tpu.memory_space<vmem>>)
    %c10_i32_104 = arith.constant 10 : i32
    %c10_i32_105 = arith.constant 10 : i32
    %c0_i32_106 = arith.constant 0 : i32
    %205 = tpu.memref_slice %arg2[%93, %c0_i32_106] : memref<100x128xf32, #tpu.memory_space<any>> -> memref<1x128xf32, #tpu.memory_space<any>>
    %206 = tpu.memref_squeeze %205 : memref<1x128xf32, #tpu.memory_space<any>> -> memref<128xf32, #tpu.memory_space<any>>
    %c0_i32_107 = arith.constant 0 : i32
    %207 = tpu.memref_slice %arg4[%c10_i32_104, %c0_i32_107] : memref<16x128xf32, #tpu.memory_space<vmem>> -> memref<1x128xf32, #tpu.memory_space<vmem>>
    %208 = tpu.memref_squeeze %207 : memref<1x128xf32, #tpu.memory_space<vmem>> -> memref<128xf32, #tpu.memory_space<vmem>>
    %209 = tpu.memref_slice %arg5[%c10_i32_105] : memref<16x!tpu.dma_semaphore, #tpu.memory_space<semaphore_mem>> -> memref<1x!tpu.dma_semaphore, #tpu.memory_space<semaphore_mem>>
    %210 = tpu.memref_squeeze %209 : memref<1x!tpu.dma_semaphore, #tpu.memory_space<semaphore_mem>> -> memref<!tpu.dma_semaphore, #tpu.memory_space<semaphore_mem>>
    tpu.wait_dma2 semaphore(%210 : memref<!tpu.dma_semaphore, #tpu.memory_space<semaphore_mem>>) src(%206 : memref<128xf32, #tpu.memory_space<any>>) dst(%208 : memref<128xf32, #tpu.memory_space<vmem>>)
    %c11_i32_108 = arith.constant 11 : i32
    %c11_i32_109 = arith.constant 11 : i32
    %c0_i32_110 = arith.constant 0 : i32
    %211 = tpu.memref_slice %arg2[%102, %c0_i32_110] : memref<100x128xf32, #tpu.memory_space<any>> -> memref<1x128xf32, #tpu.memory_space<any>>
    %212 = tpu.memref_squeeze %211 : memref<1x128xf32, #tpu.memory_space<any>> -> memref<128xf32, #tpu.memory_space<any>>
    %c0_i32_111 = arith.constant 0 : i32
    %213 = tpu.memref_slice %arg4[%c11_i32_108, %c0_i32_111] : memref<16x128xf32, #tpu.memory_space<vmem>> -> memref<1x128xf32, #tpu.memory_space<vmem>>
    %214 = tpu.memref_squeeze %213 : memref<1x128xf32, #tpu.memory_space<vmem>> -> memref<128xf32, #tpu.memory_space<vmem>>
    %215 = tpu.memref_slice %arg5[%c11_i32_109] : memref<16x!tpu.dma_semaphore, #tpu.memory_space<semaphore_mem>> -> memref<1x!tpu.dma_semaphore, #tpu.memory_space<semaphore_mem>>
    %216 = tpu.memref_squeeze %215 : memref<1x!tpu.dma_semaphore, #tpu.memory_space<semaphore_mem>> -> memref<!tpu.dma_semaphore, #tpu.memory_space<semaphore_mem>>
    tpu.wait_dma2 semaphore(%216 : memref<!tpu.dma_semaphore, #tpu.memory_space<semaphore_mem>>) src(%212 : memref<128xf32, #tpu.memory_space<any>>) dst(%214 : memref<128xf32, #tpu.memory_space<vmem>>)
    %c12_i32_112 = arith.constant 12 : i32
    %c12_i32_113 = arith.constant 12 : i32
    %c0_i32_114 = arith.constant 0 : i32
    %217 = tpu.memref_slice %arg2[%111, %c0_i32_114] : memref<100x128xf32, #tpu.memory_space<any>> -> memref<1x128xf32, #tpu.memory_space<any>>
    %218 = tpu.memref_squeeze %217 : memref<1x128xf32, #tpu.memory_space<any>> -> memref<128xf32, #tpu.memory_space<any>>
    %c0_i32_115 = arith.constant 0 : i32
    %219 = tpu.memref_slice %arg4[%c12_i32_112, %c0_i32_115] : memref<16x128xf32, #tpu.memory_space<vmem>> -> memref<1x128xf32, #tpu.memory_space<vmem>>
    %220 = tpu.memref_squeeze %219 : memref<1x128xf32, #tpu.memory_space<vmem>> -> memref<128xf32, #tpu.memory_space<vmem>>
    %221 = tpu.memref_slice %arg5[%c12_i32_113] : memref<16x!tpu.dma_semaphore, #tpu.memory_space<semaphore_mem>> -> memref<1x!tpu.dma_semaphore, #tpu.memory_space<semaphore_mem>>
    %222 = tpu.memref_squeeze %221 : memref<1x!tpu.dma_semaphore, #tpu.memory_space<semaphore_mem>> -> memref<!tpu.dma_semaphore, #tpu.memory_space<semaphore_mem>>
    tpu.wait_dma2 semaphore(%222 : memref<!tpu.dma_semaphore, #tpu.memory_space<semaphore_mem>>) src(%218 : memref<128xf32, #tpu.memory_space<any>>) dst(%220 : memref<128xf32, #tpu.memory_space<vmem>>)
    %c13_i32_116 = arith.constant 13 : i32
    %c13_i32_117 = arith.constant 13 : i32
    %c0_i32_118 = arith.constant 0 : i32
    %223 = tpu.memref_slice %arg2[%120, %c0_i32_118] : memref<100x128xf32, #tpu.memory_space<any>> -> memref<1x128xf32, #tpu.memory_space<any>>
    %224 = tpu.memref_squeeze %223 : memref<1x128xf32, #tpu.memory_space<any>> -> memref<128xf32, #tpu.memory_space<any>>
    %c0_i32_119 = arith.constant 0 : i32
    %225 = tpu.memref_slice %arg4[%c13_i32_116, %c0_i32_119] : memref<16x128xf32, #tpu.memory_space<vmem>> -> memref<1x128xf32, #tpu.memory_space<vmem>>
    %226 = tpu.memref_squeeze %225 : memref<1x128xf32, #tpu.memory_space<vmem>> -> memref<128xf32, #tpu.memory_space<vmem>>
    %227 = tpu.memref_slice %arg5[%c13_i32_117] : memref<16x!tpu.dma_semaphore, #tpu.memory_space<semaphore_mem>> -> memref<1x!tpu.dma_semaphore, #tpu.memory_space<semaphore_mem>>
    %228 = tpu.memref_squeeze %227 : memref<1x!tpu.dma_semaphore, #tpu.memory_space<semaphore_mem>> -> memref<!tpu.dma_semaphore, #tpu.memory_space<semaphore_mem>>
    tpu.wait_dma2 semaphore(%228 : memref<!tpu.dma_semaphore, #tpu.memory_space<semaphore_mem>>) src(%224 : memref<128xf32, #tpu.memory_space<any>>) dst(%226 : memref<128xf32, #tpu.memory_space<vmem>>)
    %c14_i32_120 = arith.constant 14 : i32
    %c14_i32_121 = arith.constant 14 : i32
    %c0_i32_122 = arith.constant 0 : i32
    %229 = tpu.memref_slice %arg2[%129, %c0_i32_122] : memref<100x128xf32, #tpu.memory_space<any>> -> memref<1x128xf32, #tpu.memory_space<any>>
    %230 = tpu.memref_squeeze %229 : memref<1x128xf32, #tpu.memory_space<any>> -> memref<128xf32, #tpu.memory_space<any>>
    %c0_i32_123 = arith.constant 0 : i32
    %231 = tpu.memref_slice %arg4[%c14_i32_120, %c0_i32_123] : memref<16x128xf32, #tpu.memory_space<vmem>> -> memref<1x128xf32, #tpu.memory_space<vmem>>
    %232 = tpu.memref_squeeze %231 : memref<1x128xf32, #tpu.memory_space<vmem>> -> memref<128xf32, #tpu.memory_space<vmem>>
    %233 = tpu.memref_slice %arg5[%c14_i32_121] : memref<16x!tpu.dma_semaphore, #tpu.memory_space<semaphore_mem>> -> memref<1x!tpu.dma_semaphore, #tpu.memory_space<semaphore_mem>>
    %234 = tpu.memref_squeeze %233 : memref<1x!tpu.dma_semaphore, #tpu.memory_space<semaphore_mem>> -> memref<!tpu.dma_semaphore, #tpu.memory_space<semaphore_mem>>
    tpu.wait_dma2 semaphore(%234 : memref<!tpu.dma_semaphore, #tpu.memory_space<semaphore_mem>>) src(%230 : memref<128xf32, #tpu.memory_space<any>>) dst(%232 : memref<128xf32, #tpu.memory_space<vmem>>)
    %c15_i32_124 = arith.constant 15 : i32
    %c15_i32_125 = arith.constant 15 : i32
    %c0_i32_126 = arith.constant 0 : i32
    %235 = tpu.memref_slice %arg2[%138, %c0_i32_126] : memref<100x128xf32, #tpu.memory_space<any>> -> memref<1x128xf32, #tpu.memory_space<any>>
    %236 = tpu.memref_squeeze %235 : memref<1x128xf32, #tpu.memory_space<any>> -> memref<128xf32, #tpu.memory_space<any>>
    %c0_i32_127 = arith.constant 0 : i32
    %237 = tpu.memref_slice %arg4[%c15_i32_124, %c0_i32_127] : memref<16x128xf32, #tpu.memory_space<vmem>> -> memref<1x128xf32, #tpu.memory_space<vmem>>
    %238 = tpu.memref_squeeze %237 : memref<1x128xf32, #tpu.memory_space<vmem>> -> memref<128xf32, #tpu.memory_space<vmem>>
    %239 = tpu.memref_slice %arg5[%c15_i32_125] : memref<16x!tpu.dma_semaphore, #tpu.memory_space<semaphore_mem>> -> memref<1x!tpu.dma_semaphore, #tpu.memory_space<semaphore_mem>>
    %240 = tpu.memref_squeeze %239 : memref<1x!tpu.dma_semaphore, #tpu.memory_space<semaphore_mem>> -> memref<!tpu.dma_semaphore, #tpu.memory_space<semaphore_mem>>
    tpu.wait_dma2 semaphore(%240 : memref<!tpu.dma_semaphore, #tpu.memory_space<semaphore_mem>>) src(%236 : memref<128xf32, #tpu.memory_space<any>>) dst(%238 : memref<128xf32, #tpu.memory_space<vmem>>)
    %c0 = arith.constant 0 : index
    %c0_128 = arith.constant 0 : index
    %241 = vector.load %arg4[%c0, %c0_128] : memref<16x128xf32, #tpu.memory_space<vmem>>, vector<16x128xf32>
    %c0_129 = arith.constant 0 : index
    %c0_130 = arith.constant 0 : index
    %242 = vector.load %arg3[%c0_129, %c0_130] : memref<16x128xf32, #tpu.memory_space<vmem>>, vector<16x128xf32>
    tpu.vector_store %arg3[%c0_129, %c0_130], %241 {strides = array<i32>} : memref<16x128xf32, #tpu.memory_space<vmem>>, vector<16x128xf32>,
    return
  }
  func.func @transform_1(%arg0: i32, %arg1: memref<16xi32, #tpu.memory_space<smem>>) -> (i32, i32) {
    %c0_i32 = arith.constant 0 : i32
    %c0_i32_0 = arith.constant 0 : i32
    return %arg0, %c0_i32 : i32, i32
  }
}

</mosaic_0001>

<bundles_post_ra>
// kernel: tpu_custom_call.1
= control target key start
LH: loop header
LB: loop body
LE: loop exit
PB: predicated region body
PF: predicated region fallthrough
CT: control target
= control target key end

     0   :  { %s1318_s0 = inlined_call_operand.hbm [shape: s32[16], index: 0, kind: input, shape index: {}]   ;;  %s1319_s1 = inlined_call_operand.hbm [shape: f32[100,128], index: 1, kind: input, shape index: {}]   ;;  %s1320_s2 = inlined_call_operand.hbm [shape: f32[16,128], index: 2, kind: output, shape index: {}]  }
   0x1   :  { %s544_s11 = scalar_lea.hbm %s1318_s0, 16 }
   0x2   :  { %p545_p0 = scmp.ne.s32.totalorder %s1318_s0, %s544_s11  ;;  %p548_p1 = scmp.lt.u32.totalorder %s544_s11, %s1318_s0 }
   0x4   :  { %p550_p2 = pnand %p548_p1, %p545_p0 }
   0x6   :  { %553 = shalt.err (!%p550_p2)  }
   0x7   :  { %s996_s16 = smov [#allocation5]  }
   0x8   :  { %8 = dma.hbm_to_smem %s1318_s0, 16, %s996_s16, [#allocation4] }
   0x9   :  { %960 = dma.done.wait [#allocation4], 16 }
   0xa   :  { %961 = vsyncadd [#allocation4], 4294967280 }
   0xb   :  { %10 = sfence }
   0xc   :  { %11 = vsyncpa [#allocation7], 0  ;;  %s13_s19 = sld [smem:[#allocation5]]  ;;  %s997_s20 = smov [#allocation2]  }
   0xd   :  { %s23_s21 = sshll.u32 %s997_s20, 4  ;;  %s1043_s22 = sld [smem:[#allocation5 + $0x1]]  ;;  %s1045_s21 = int_to_ptr.vmem [resolvable:$true] %s23_s21 }
   0xe   :  { %s998_s23 = smov [#allocation2 + $0x1]   ;;  %s1047_s25 = sld [smem:[#allocation5 + $0x2]] }
   0xf   :  { %s40_s24 = sshll.u32 %s998_s23, 4  ;;  %s999_s26 = smov [#allocation2 + $0x2]   ;;  %s1049_s24 = int_to_ptr.vmem [resolvable:$true] %s40_s24 }
  0x10   :  { %s57_s0 = sshll.u32 %s999_s26, 4  ;;  %s1051_s27 = sld [smem:[#allocation5 + $0x3]]  ;;  %s1053_s0 = int_to_ptr.vmem [resolvable:$true] %s57_s0 }
  0x11   :  { %s1062_s8 = scalar_lea.hbm %s1319_s1, 1664 }
  0x12   :  { %s477_s28 = sshll.u32 %s13_s19, 4 }
  0x13   :  { %s15_s3 = scalar_lea.hbm %s1319_s1, %s477_s28  ;;  %s479_s4 = sshll.u32 %s1043_s22, 4 }
  0x14   :  { %s554_s5 = scalar_lea.hbm %s15_s3, 16  ;;  %p557_p4 = scmp.lt.u32.totalorder %s15_s3, %s1319_s1 }
  0x15   :  { %p555_p3 = scmp.ne.s32.totalorder %s15_s3, %s554_s5  ;;  %p558_p5 = scmp.lt.u32.totalorder %s1062_s8, %s554_s5 }
  0x16   :  { %p560_p7 = scmp.lt.u32.totalorder %s554_s5, %s15_s3 }
  0x17   :  { %p559_p6 = por %p558_p5, %p557_p4 }
  0x19   :  { %p561_p8 = por %p560_p7, %p559_p6 }
  0x1b   :  { %p562_p9 = pnand %p561_p8, %p555_p3 }
  0x1d   :  { %565 = shalt.err (!%p562_p9)  }
  0x1e   :  { %s566_s11 = scalar_lea.vmem %s1045_s21, 16  ;;  %s1071_s12 = scalar_lea.vmem %s1045_s21, 256 }
  0x1f   :  { %p567_p10 = scmp.ne.s32.totalorder %s1045_s21, %s566_s11  ;;  %p571_p11 = scmp.lt.s32.totalorder %s1045_s21, %s1045_s21 }
  0x20   :  { %p572_p12 = scmp.lt.s32.totalorder %s1071_s12, %s566_s11 }
  0x22   :  { %p573_p13 = por %p572_p12, %p571_p11 }
  0x24   :  { %p574_p0 = pnand %p573_p13, %p567_p10 }
  0x26   :  { %577 = shalt.err (!%p574_p0)  }
  0x27   :  { %26 = dma.hbm_to_vmem [thread:$0]  %s15_s3, 16, %s1045_s21, [#allocation3] }
  0x28   :  { %s30_s15 = scalar_lea.hbm %s1319_s1, %s479_s4  ;;  %s481_s16 = sshll.u32 %s1047_s25, 4 }
  0x29   :  { %s578_s17 = scalar_lea.hbm %s30_s15, 16  ;;  %p581_p2 = scmp.lt.u32.totalorder %s30_s15, %s1319_s1 }
  0x2a   :  { %p579_p1 = scmp.ne.s32.totalorder %s30_s15, %s578_s17  ;;  %p582_p3 = scmp.lt.u32.totalorder %s1062_s8, %s578_s17 }
  0x2b   :  { %p584_p5 = scmp.lt.u32.totalorder %s578_s17, %s30_s15 }
  0x2c   :  { %p583_p4 = por %p582_p3, %p581_p2 }
  0x2e   :  { %p585_p6 = por %p584_p5, %p583_p4 }
  0x30   :  { %p586_p7 = pnand %p585_p6, %p579_p1 }
  0x32   :  { %589 = shalt.err (!%p586_p7)  }
  0x33   :  { %s590_s20 = scalar_lea.vmem %s1049_s24, 16  ;;  %p595_p9 = scmp.lt.s32.totalorder %s1049_s24, %s1045_s21 }
  0x34   :  { %p591_p8 = scmp.ne.s32.totalorder %s1049_s24, %s590_s20  ;;  %p596_p10 = scmp.lt.s32.totalorder %s1071_s12, %s590_s20 }
  0x36   :  { %p597_p11 = por %p596_p10, %p595_p9 }
  0x38   :  { %p598_p12 = pnand %p597_p11, %p591_p8 }
  0x3a   :  { %601 = shalt.err (!%p598_p12)  }
  0x3b   :  { %43 = dma.hbm_to_vmem [thread:$0]  %s30_s15, 16, %s1049_s24, [#allocation3 + $0x1] }
  0x3c   :  { %s47_s25 = scalar_lea.hbm %s1319_s1, %s481_s16  ;;  %s483_s26 = sshll.u32 %s1051_s27, 4 }
  0x3d   :  { %s602_s28 = scalar_lea.hbm %s47_s25, 16  ;;  %p605_p0 = scmp.lt.u32.totalorder %s47_s25, %s1319_s1 }
  0x3e   :  { %p603_p13 = scmp.ne.s32.totalorder %s47_s25, %s602_s28  ;;  %p606_p1 = scmp.lt.u32.totalorder %s1062_s8, %s602_s28 }
  0x3f   :  { %p608_p3 = scmp.lt.u32.totalorder %s602_s28, %s47_s25 }
  0x40   :  { %p607_p2 = por %p606_p1, %p605_p0 }
  0x42   :  { %p609_p4 = por %p608_p3, %p607_p2 }
  0x44   :  { %p610_p5 = pnand %p609_p4, %p603_p13 }
  0x46   :  { %613 = shalt.err (!%p610_p5)  }
  0x47   :  { %s614_s24 = scalar_lea.vmem %s1053_s0, 16  ;;  %p619_p7 = scmp.lt.s32.totalorder %s1053_s0, %s1045_s21 }
  0x48   :  { %p615_p6 = scmp.ne.s32.totalorder %s1053_s0, %s614_s24  ;;  %p620_p8 = scmp.lt.s32.totalorder %s1071_s12, %s614_s24 }
  0x4a   :  { %p621_p9 = por %p620_p8, %p619_p7 }
  0x4c   :  { %p622_p10 = pnand %p621_p9, %p615_p6 }
  0x4e   :  { %625 = shalt.err (!%p622_p10)  }
  0x4f   :  { %60 = dma.hbm_to_vmem [thread:$0]  %s47_s25, 16, %s1053_s0, [#allocation3 + $0x2] }
  0x50   :  { %s64_s4 = scalar_lea.hbm %s1319_s1, %s483_s26  ;;  %s1000_s5 = smov [#allocation2 + $0x3]  }
  0x51   :  { %s74_s6 = sshll.u32 %s1000_s5, 4  ;;  %s1108_s7 = sld [smem:[#allocation5 + $0x4]]  ;;  %s75_s6 = int_to_ptr.vmem [resolvable:$true] %s74_s6 }
  0x52   :  { %s626_s9 = scalar_lea.hbm %s64_s4, 16  ;;  %p629_p12 = scmp.lt.u32.totalorder %s64_s4, %s1319_s1 }
  0x53   :  { %p627_p11 = scmp.ne.s32.totalorder %s64_s4, %s626_s9  ;;  %p630_p13 = scmp.lt.u32.totalorder %s1062_s8, %s626_s9 }
  0x54   :  { %p632_p1 = scmp.lt.u32.totalorder %s626_s9, %s64_s4 }
  0x55   :  { %p631_p0 = por %p630_p13, %p629_p12 }
  0x57   :  { %p633_p2 = por %p632_p1, %p631_p0 }
  0x59   :  { %p634_p3 = pnand %p633_p2, %p627_p11 }
  0x5b   :  { %637 = shalt.err (!%p634_p3)  }
  0x5c   :  { %s638_s0 = scalar_lea.vmem %s75_s6, 16  ;;  %p643_p5 = scmp.lt.s32.totalorder %s75_s6, %s1045_s21 }
  0x5d   :  { %p639_p4 = scmp.ne.s32.totalorder %s75_s6, %s638_s0  ;;  %p644_p6 = scmp.lt.s32.totalorder %s1071_s12, %s638_s0 }
  0x5f   :  { %p645_p7 = por %p644_p6, %p643_p5 }
  0x61   :  { %p646_p8 = pnand %p645_p7, %p639_p4 }
  0x63   :  { %649 = shalt.err (!%p646_p8)  }
  0x64   :  { %77 = dma.hbm_to_vmem [thread:$0]  %s64_s4, 16, %s75_s6, [#allocation3 + $0x3] }
  0x65   :  { %s1001_s13 = smov [#allocation2 + $0x4]   ;;  %s1116_s15 = sld [smem:[#allocation5 + $0x5]] }
  0x66   :  { %s91_s14 = sshll.u32 %s1001_s13, 4  ;;  %s1002_s16 = smov [#allocation2 + $0x5]   ;;  %s92_s14 = int_to_ptr.vmem [resolvable:$true] %s91_s14 }
  0x67   :  { %s108_s17 = sshll.u32 %s1002_s16, 4  ;;  %s1118_s18 = sld [smem:[#allocation5 + $0x6]]  ;;  %s1121_s17 = int_to_ptr.vmem [resolvable:$true] %s108_s17 }
  0x68   :  { %s485_s19 = sshll.u32 %s1108_s7, 4 }
  0x69   :  { %s81_s23 = scalar_lea.hbm %s1319_s1, %s485_s19 }
  0x6a   :  { %s650_s25 = scalar_lea.hbm %s81_s23, 16  ;;  %p653_p10 = scmp.lt.u32.totalorder %s81_s23, %s1319_s1 }
  0x6b   :  { %p651_p9 = scmp.ne.s32.totalorder %s81_s23, %s650_s25  ;;  %p654_p11 = scmp.lt.u32.totalorder %s1062_s8, %s650_s25 }
  0x6c   :  { %p656_p13 = scmp.lt.u32.totalorder %s650_s25, %s81_s23 }
  0x6d   :  { %p655_p12 = por %p654_p11, %p653_p10 }
  0x6f   :  { %p657_p0 = por %p656_p13, %p655_p12 }
  0x71   :  { %p658_p1 = pnand %p657_p0, %p651_p9 }
  0x73   :  { %661 = shalt.err (!%p658_p1)  }
  0x74   :  { %s662_s29 = scalar_lea.vmem %s92_s14, 16  ;;  %p667_p3 = scmp.lt.s32.totalorder %s92_s14, %s1045_s21 }
  0x75   :  { %p663_p2 = scmp.ne.s32.totalorder %s92_s14, %s662_s29  ;;  %p668_p4 = scmp.lt.s32.totalorder %s1071_s12, %s662_s29 }
  0x77   :  { %p669_p5 = por %p668_p4, %p667_p3 }
  0x79   :  { %p670_p6 = pnand %p669_p5, %p663_p2 }
  0x7b   :  { %673 = shalt.err (!%p670_p6)  }
  0x7c   :  { %94 = dma.hbm_to_vmem [thread:$0]  %s81_s23, 16, %s92_s14, [#allocation3 + $0x4] }
  0x7d   :  { %s487_s30 = sshll.u32 %s1116_s15, 4  ;;  %s1003_s24 = smov [#allocation2 + $0x6]  }
  0x7e   :  { %s125_s27 = sshll.u32 %s1003_s24, 4  ;;  %s98_s5 = scalar_lea.hbm %s1319_s1, %s487_s30  ;;  %s1136_s27 = int_to_ptr.vmem [resolvable:$true] %s125_s27 }
  0x7f   :  { %s674_s6 = scalar_lea.hbm %s98_s5, 16  ;;  %p677_p8 = scmp.lt.u32.totalorder %s98_s5, %s1319_s1 }
  0x80   :  { %p675_p7 = scmp.ne.s32.totalorder %s98_s5, %s674_s6  ;;  %p678_p9 = scmp.lt.u32.totalorder %s1062_s8, %s674_s6 }
  0x81   :  { %p680_p11 = scmp.lt.u32.totalorder %s674_s6, %s98_s5 }
  0x82   :  { %p679_p10 = por %p678_p9, %p677_p8 }
  0x84   :  { %p681_p12 = por %p680_p11, %p679_p10 }
  0x86   :  { %p682_p13 = pnand %p681_p12, %p675_p7 }
  0x88   :  { %685 = shalt.err (!%p682_p13)  }
  0x89   :  { %s686_s10 = scalar_lea.vmem %s1121_s17, 16  ;;  %p691_p1 = scmp.lt.s32.totalorder %s1121_s17, %s1045_s21 }
  0x8a   :  { %p687_p0 = scmp.ne.s32.totalorder %s1121_s17, %s686_s10  ;;  %p692_p2 = scmp.lt.s32.totalorder %s1071_s12, %s686_s10 }
  0x8c   :  { %p693_p3 = por %p692_p2, %p691_p1 }
  0x8e   :  { %p694_p4 = pnand %p693_p3, %p687_p0 }
  0x90   :  { %697 = shalt.err (!%p694_p4)  }
  0x91   :  { %111 = dma.hbm_to_vmem [thread:$0]  %s98_s5, 16, %s1121_s17, [#allocation3 + $0x5] }
  0x92   :  { %s489_s11 = sshll.u32 %s1118_s18, 4  ;;  %s1149_s0 = sld [smem:[#allocation5 + $0x7]] }
  0x93   :  { %s115_s15 = scalar_lea.hbm %s1319_s1, %s489_s11 }
  0x94   :  { %s698_s16 = scalar_lea.hbm %s115_s15, 16  ;;  %p701_p6 = scmp.lt.u32.totalorder %s115_s15, %s1319_s1 }
  0x95   :  { %p699_p5 = scmp.ne.s32.totalorder %s115_s15, %s698_s16  ;;  %p702_p7 = scmp.lt.u32.totalorder %s1062_s8, %s698_s16 }
  0x96   :  { %p704_p9 = scmp.lt.u32.totalorder %s698_s16, %s115_s15 }
  0x97   :  { %p703_p8 = por %p702_p7, %p701_p6 }
  0x99   :  { %p705_p10 = por %p704_p9, %p703_p8 }
  0x9b   :  { %p706_p11 = pnand %p705_p10, %p699_p5 }
  0x9d   :  { %709 = shalt.err (!%p706_p11)  }
  0x9e   :  { %s710_s17 = scalar_lea.vmem %s1136_s27, 16  ;;  %p715_p13 = scmp.lt.s32.totalorder %s1136_s27, %s1045_s21 }
  0x9f   :  { %p711_p12 = scmp.ne.s32.totalorder %s1136_s27, %s710_s17  ;;  %p716_p0 = scmp.lt.s32.totalorder %s1071_s12, %s710_s17 }
  0xa1   :  { %p717_p1 = por %p716_p0, %p715_p13 }
  0xa3   :  { %p718_p2 = pnand %p717_p1, %p711_p12 }
  0xa5   :  { %721 = shalt.err (!%p718_p2)  }
  0xa6   :  { %128 = dma.hbm_to_vmem [thread:$0]  %s115_s15, 16, %s1136_s27, [#allocation3 + $0x6] }
  0xa7   :  { %s1004_s18 = smov [#allocation2 + $0x7]   ;;  %s1164_s23 = sld [smem:[#allocation5 + $0x8]] }
  0xa8   :  { %s142_s22 = sshll.u32 %s1004_s18, 4  ;;  %s1005_s25 = smov [#allocation2 + $0x8]   ;;  %s143_s22 = int_to_ptr.vmem [resolvable:$true] %s142_s22 }
  0xa9   :  { %s159_s26 = sshll.u32 %s1005_s25, 4  ;;  %s1166_s28 = sld [smem:[#allocation5 + $0x9]]  ;;  %s1169_s26 = int_to_ptr.vmem [resolvable:$true] %s159_s26 }
  0xaa   :  { %s491_s29 = sshll.u32 %s1149_s0, 4 }
  0xab   :  { %s132_s3 = scalar_lea.hbm %s1319_s1, %s491_s29 }
  0xac   :  { %s722_s4 = scalar_lea.hbm %s132_s3, 16  ;;  %p725_p4 = scmp.lt.u32.totalorder %s132_s3, %s1319_s1 }
  0xad   :  { %p723_p3 = scmp.ne.s32.totalorder %s132_s3, %s722_s4  ;;  %p726_p5 = scmp.lt.u32.totalorder %s1062_s8, %s722_s4 }
  0xae   :  { %p728_p7 = scmp.lt.u32.totalorder %s722_s4, %s132_s3 }
  0xaf   :  { %p727_p6 = por %p726_p5, %p725_p4 }
  0xb1   :  { %p729_p8 = por %p728_p7, %p727_p6 }
  0xb3   :  { %p730_p9 = pnand %p729_p8, %p723_p3 }
  0xb5   :  { %733 = shalt.err (!%p730_p9)  }
  0xb6   :  { %s734_s6 = scalar_lea.vmem %s143_s22, 16  ;;  %p739_p11 = scmp.lt.s32.totalorder %s143_s22, %s1045_s21 }
  0xb7   :  { %p735_p10 = scmp.ne.s32.totalorder %s143_s22, %s734_s6  ;;  %p740_p12 = scmp.lt.s32.totalorder %s1071_s12, %s734_s6 }
  0xb9   :  { %p741_p13 = por %p740_p12, %p739_p11 }
  0xbb   :  { %p742_p0 = pnand %p741_p13, %p735_p10 }
  0xbd   :  { %745 = shalt.err (!%p742_p0)  }
  0xbe   :  { %145 = dma.hbm_to_vmem [thread:$0]  %s132_s3, 16, %s143_s22, [#allocation3 + $0x7] }
  0xbf   :  { %s493_s7 = sshll.u32 %s1164_s23, 4  ;;  %s1006_s9 = smov [#allocation2 + $0x9]  }
  0xc0   :  { %s176_s10 = sshll.u32 %s1006_s9, 4  ;;  %s149_s13 = scalar_lea.hbm %s1319_s1, %s493_s7  ;;  %s1184_s10 = int_to_ptr.vmem [resolvable:$true] %s176_s10 }
  0xc1   :  { %s746_s14 = scalar_lea.hbm %s149_s13, 16  ;;  %p749_p2 = scmp.lt.u32.totalorder %s149_s13, %s1319_s1 }
  0xc2   :  { %p747_p1 = scmp.ne.s32.totalorder %s149_s13, %s746_s14  ;;  %p750_p3 = scmp.lt.u32.totalorder %s1062_s8, %s746_s14 }
  0xc3   :  { %p752_p5 = scmp.lt.u32.totalorder %s746_s14, %s149_s13 }
  0xc4   :  { %p751_p4 = por %p750_p3, %p749_p2 }
  0xc6   :  { %p753_p6 = por %p752_p5, %p751_p4 }
  0xc8   :  { %p754_p7 = pnand %p753_p6, %p747_p1 }
  0xca   :  { %757 = shalt.err (!%p754_p7)  }
  0xcb   :  { %s758_s19 = scalar_lea.vmem %s1169_s26, 16  ;;  %p763_p9 = scmp.lt.s32.totalorder %s1169_s26, %s1045_s21 }
  0xcc   :  { %p759_p8 = scmp.ne.s32.totalorder %s1169_s26, %s758_s19  ;;  %p764_p10 = scmp.lt.s32.totalorder %s1071_s12, %s758_s19 }
  0xce   :  { %p765_p11 = por %p764_p10, %p763_p9 }
  0xd0   :  { %p766_p12 = pnand %p765_p11, %p759_p8 }
  0xd2   :  { %769 = shalt.err (!%p766_p12)  }
  0xd3   :  { %162 = dma.hbm_to_vmem [thread:$0]  %s149_s13, 16, %s1169_s26, [#allocation3 + $0x8] }
  0xd4   :  { %s495_s20 = sshll.u32 %s1166_s28, 4  ;;  %s1197_s17 = sld [smem:[#allocation5 + $0xa]] }
  0xd5   :  { %s166_s23 = scalar_lea.hbm %s1319_s1, %s495_s20 }
  0xd6   :  { %s770_s25 = scalar_lea.hbm %s166_s23, 16  ;;  %p773_p0 = scmp.lt.u32.totalorder %s166_s23, %s1319_s1 }
  0xd7   :  { %p771_p13 = scmp.ne.s32.totalorder %s166_s23, %s770_s25  ;;  %p774_p1 = scmp.lt.u32.totalorder %s1062_s8, %s770_s25 }
  0xd8   :  { %p776_p3 = scmp.lt.u32.totalorder %s770_s25, %s166_s23 }
  0xd9   :  { %p775_p2 = por %p774_p1, %p773_p0 }
  0xdb   :  { %p777_p4 = por %p776_p3, %p775_p2 }
  0xdd   :  { %p778_p5 = pnand %p777_p4, %p771_p13 }
  0xdf   :  { %781 = shalt.err (!%p778_p5)  }
  0xe0   :  { %s782_s26 = scalar_lea.vmem %s1184_s10, 16  ;;  %p787_p7 = scmp.lt.s32.totalorder %s1184_s10, %s1045_s21 }
  0xe1   :  { %p783_p6 = scmp.ne.s32.totalorder %s1184_s10, %s782_s26  ;;  %p788_p8 = scmp.lt.s32.totalorder %s1071_s12, %s782_s26 }
  0xe3   :  { %p789_p9 = por %p788_p8, %p787_p7 }
  0xe5   :  { %p790_p10 = pnand %p789_p9, %p783_p6 }
  0xe7   :  { %793 = shalt.err (!%p790_p10)  }
  0xe8   :  { %179 = dma.hbm_to_vmem [thread:$0]  %s166_s23, 16, %s1184_s10, [#allocation3 + $0x9] }
  0xe9   :  { %s1007_s28 = smov [#allocation2 + $0xa]   ;;  %s1212_s3 = sld [smem:[#allocation5 + $0xb]] }
  0xea   :  { %s193_s24 = sshll.u32 %s1007_s28, 4  ;;  %s1008_s4 = smov [#allocation2 + $0xb]   ;;  %s194_s24 = int_to_ptr.vmem [resolvable:$true] %s193_s24 }
  0xeb   :  { %s210_s5 = sshll.u32 %s1008_s4, 4  ;;  %s1214_s27 = sld [smem:[#allocation5 + $0xc]]  ;;  %s1217_s5 = int_to_ptr.vmem [resolvable:$true] %s210_s5 }
  0xec   :  { %s497_s6 = sshll.u32 %s1197_s17, 4 }
  0xed   :  { %s183_s11 = scalar_lea.hbm %s1319_s1, %s497_s6 }
  0xee   :  { %s794_s0 = scalar_lea.hbm %s183_s11, 16  ;;  %p797_p12 = scmp.lt.u32.totalorder %s183_s11, %s1319_s1 }
  0xef   :  { %p795_p11 = scmp.ne.s32.totalorder %s183_s11, %s794_s0  ;;  %p798_p13 = scmp.lt.u32.totalorder %s1062_s8, %s794_s0 }
  0xf0   :  { %p800_p1 = scmp.lt.u32.totalorder %s794_s0, %s183_s11 }
  0xf1   :  { %p799_p0 = por %p798_p13, %p797_p12 }
  0xf3   :  { %p801_p2 = por %p800_p1, %p799_p0 }
  0xf5   :  { %p802_p3 = pnand %p801_p2, %p795_p11 }
  0xf7   :  { %805 = shalt.err (!%p802_p3)  }
  0xf8   :  { %s806_s14 = scalar_lea.vmem %s194_s24, 16  ;;  %p811_p5 = scmp.lt.s32.totalorder %s194_s24, %s1045_s21 }
  0xf9   :  { %p807_p4 = scmp.ne.s32.totalorder %s194_s24, %s806_s14  ;;  %p812_p6 = scmp.lt.s32.totalorder %s1071_s12, %s806_s14 }
  0xfb   :  { %p813_p7 = por %p812_p6, %p811_p5 }
  0xfd   :  { %p814_p8 = pnand %p813_p7, %p807_p4 }
  0xff   :  { %817 = shalt.err (!%p814_p8)  }
 0x100   :  { %196 = dma.hbm_to_vmem [thread:$0]  %s183_s11, 16, %s194_s24, [#allocation3 + $0xa] }
 0x101   :  { %s499_s15 = sshll.u32 %s1212_s3, 4  ;;  %s1009_s16 = smov [#allocation2 + $0xc]  }
 0x102   :  { %s227_s19 = sshll.u32 %s1009_s16, 4  ;;  %s200_s18 = scalar_lea.hbm %s1319_s1, %s499_s15  ;;  %s1232_s19 = int_to_ptr.vmem [resolvable:$true] %s227_s19 }
 0x103   :  { %s818_s22 = scalar_lea.hbm %s200_s18, 16  ;;  %p821_p10 = scmp.lt.u32.totalorder %s200_s18, %s1319_s1 }
 0x104   :  { %p819_p9 = scmp.ne.s32.totalorder %s200_s18, %s818_s22  ;;  %p822_p11 = scmp.lt.u32.totalorder %s1062_s8, %s818_s22 }
 0x105   :  { %p824_p13 = scmp.lt.u32.totalorder %s818_s22, %s200_s18 }
 0x106   :  { %p823_p12 = por %p822_p11, %p821_p10 }
 0x108   :  { %p825_p0 = por %p824_p13, %p823_p12 }
 0x10a   :  { %p826_p1 = pnand %p825_p0, %p819_p9 }
 0x10c   :  { %829 = shalt.err (!%p826_p1)  }
 0x10d   :  { %s830_s29 = scalar_lea.vmem %s1217_s5, 16  ;;  %p835_p3 = scmp.lt.s32.totalorder %s1217_s5, %s1045_s21 }
 0x10e   :  { %p831_p2 = scmp.ne.s32.totalorder %s1217_s5, %s830_s29  ;;  %p836_p4 = scmp.lt.s32.totalorder %s1071_s12, %s830_s29 }
 0x110   :  { %p837_p5 = por %p836_p4, %p835_p3 }
 0x112   :  { %p838_p6 = pnand %p837_p5, %p831_p2 }
 0x114   :  { %841 = shalt.err (!%p838_p6)  }
 0x115   :  { %213 = dma.hbm_to_vmem [thread:$0]  %s200_s18, 16, %s1217_s5, [#allocation3 + $0xb] }
 0x116   :  { %s501_s30 = sshll.u32 %s1214_s27, 4  ;;  %s1245_s26 = sld [smem:[#allocation5 + $0xd]] }
 0x117   :  { %s217_s3 = scalar_lea.hbm %s1319_s1, %s501_s30 }
 0x118   :  { %s842_s4 = scalar_lea.hbm %s217_s3, 16  ;;  %p845_p8 = scmp.lt.u32.totalorder %s217_s3, %s1319_s1 }
 0x119   :  { %p843_p7 = scmp.ne.s32.totalorder %s217_s3, %s842_s4  ;;  %p846_p9 = scmp.lt.u32.totalorder %s1062_s8, %s842_s4 }
 0x11a   :  { %p848_p11 = scmp.lt.u32.totalorder %s842_s4, %s217_s3 }
 0x11b   :  { %p847_p10 = por %p846_p9, %p845_p8 }
 0x11d   :  { %p849_p12 = por %p848_p11, %p847_p10 }
 0x11f   :  { %p850_p13 = pnand %p849_p12, %p843_p7 }
 0x121   :  { %853 = shalt.err (!%p850_p13)  }
 0x122   :  { %s854_s5 = scalar_lea.vmem %s1232_s19, 16  ;;  %p859_p1 = scmp.lt.s32.totalorder %s1232_s19, %s1045_s21 }
 0x123   :  { %p855_p0 = scmp.ne.s32.totalorder %s1232_s19, %s854_s5  ;;  %p860_p2 = scmp.lt.s32.totalorder %s1071_s12, %s854_s5 }
 0x125   :  { %p861_p3 = por %p860_p2, %p859_p1 }
 0x127   :  { %p862_p4 = pnand %p861_p3, %p855_p0 }
 0x129   :  { %865 = shalt.err (!%p862_p4)  }
 0x12a   :  { %230 = dma.hbm_to_vmem [thread:$0]  %s217_s3, 16, %s1232_s19, [#allocation3 + $0xc] }
 0x12b   :  { %s1010_s27 = smov [#allocation2 + $0xd]   ;;  %s1260_s11 = sld [smem:[#allocation5 + $0xe]] }
 0x12c   :  { %s244_s9 = sshll.u32 %s1010_s27, 4  ;;  %s1011_s0 = smov [#allocation2 + $0xe]   ;;  %s245_s9 = int_to_ptr.vmem [resolvable:$true] %s244_s9 }
 0x12d   :  { %s261_s13 = sshll.u32 %s1011_s0, 4  ;;  %s1262_s10 = sld [smem:[#allocation5 + $0xf]]  ;;  %s1265_s13 = int_to_ptr.vmem [resolvable:$true] %s261_s13 }
 0x12e   :  { %s503_s14 = sshll.u32 %s1245_s26, 4 }
 0x12f   :  { %s234_s20 = scalar_lea.hbm %s1319_s1, %s503_s14 }
 0x130   :  { %s866_s17 = scalar_lea.hbm %s234_s20, 16  ;;  %p869_p6 = scmp.lt.u32.totalorder %s234_s20, %s1319_s1 }
 0x131   :  { %p867_p5 = scmp.ne.s32.totalorder %s234_s20, %s866_s17  ;;  %p870_p7 = scmp.lt.u32.totalorder %s1062_s8, %s866_s17 }
 0x132   :  { %p872_p9 = scmp.lt.u32.totalorder %s866_s17, %s234_s20 }
 0x133   :  { %p871_p8 = por %p870_p7, %p869_p6 }
 0x135   :  { %p873_p10 = por %p872_p9, %p871_p8 }
 0x137   :  { %p874_p11 = pnand %p873_p10, %p867_p5 }
 0x139   :  { %877 = shalt.err (!%p874_p11)  }
 0x13a   :  { %s878_s22 = scalar_lea.vmem %s245_s9, 16  ;;  %p883_p13 = scmp.lt.s32.totalorder %s245_s9, %s1045_s21 }
 0x13b   :  { %p879_p12 = scmp.ne.s32.totalorder %s245_s9, %s878_s22  ;;  %p884_p0 = scmp.lt.s32.totalorder %s1071_s12, %s878_s22 }
 0x13d   :  { %p885_p1 = por %p884_p0, %p883_p13 }
 0x13f   :  { %p886_p2 = pnand %p885_p1, %p879_p12 }
 0x141   :  { %889 = shalt.err (!%p886_p2)  }
 0x142   :  { %247 = dma.hbm_to_vmem [thread:$0]  %s234_s20, 16, %s245_s9, [#allocation3 + $0xd] }
 0x143   :  { %s505_s23 = sshll.u32 %s1260_s11, 4  ;;  %s1012_s25 = smov [#allocation2 + $0xf]  }
 0x144   :  { %s278_s29 = sshll.u32 %s1012_s25, 4  ;;  %s251_s28 = scalar_lea.hbm %s1319_s1, %s505_s23  ;;  %s1280_s29 = int_to_ptr.vmem [resolvable:$true] %s278_s29 }
 0x145   :  { %s890_s24 = scalar_lea.hbm %s251_s28, 16  ;;  %p893_p4 = scmp.lt.u32.totalorder %s251_s28, %s1319_s1 }
 0x146   :  { %p891_p3 = scmp.ne.s32.totalorder %s251_s28, %s890_s24  ;;  %p894_p5 = scmp.lt.u32.totalorder %s1062_s8, %s890_s24 }
 0x147   :  { %p896_p7 = scmp.lt.u32.totalorder %s890_s24, %s251_s28 }
 0x148   :  { %p895_p6 = por %p894_p5, %p893_p4 }
 0x14a   :  { %p897_p8 = por %p896_p7, %p895_p6 }
 0x14c   :  { %p898_p9 = pnand %p897_p8, %p891_p3 }
 0x14e   :  { %901 = shalt.err (!%p898_p9)  }
 0x14f   :  { %s902_s6 = scalar_lea.vmem %s1265_s13, 16  ;;  %p907_p11 = scmp.lt.s32.totalorder %s1265_s13, %s1045_s21 }
 0x150   :  { %p903_p10 = scmp.ne.s32.totalorder %s1265_s13, %s902_s6  ;;  %p908_p12 = scmp.lt.s32.totalorder %s1071_s12, %s902_s6 }
 0x152   :  { %p909_p13 = por %p908_p12, %p907_p11 }
 0x154   :  { %p910_p0 = pnand %p909_p13, %p903_p10 }
 0x156   :  { %913 = shalt.err (!%p910_p0)  }
 0x157   :  { %264 = dma.hbm_to_vmem [thread:$0]  %s251_s28, 16, %s1265_s13, [#allocation3 + $0xe] }
 0x158   :  { %s507_s7 = sshll.u32 %s1262_s10, 4 }
 0x159   :  { %s268_s9 = scalar_lea.hbm %s1319_s1, %s507_s7 }
 0x15a   :  { %s914_s11 = scalar_lea.hbm %s268_s9, 16  ;;  %p917_p2 = scmp.lt.u32.totalorder %s268_s9, %s1319_s1 }
 0x15b   :  { %p915_p1 = scmp.ne.s32.totalorder %s268_s9, %s914_s11  ;;  %p918_p3 = scmp.lt.u32.totalorder %s1062_s8, %s914_s11 }
 0x15c   :  { %p920_p5 = scmp.lt.u32.totalorder %s914_s11, %s268_s9 }
 0x15d   :  { %p919_p4 = por %p918_p3, %p917_p2 }
 0x15f   :  { %p921_p6 = por %p920_p5, %p919_p4 }
 0x161   :  { %p922_p7 = pnand %p921_p6, %p915_p1 }
 0x163   :  { %925 = shalt.err (!%p922_p7)  }
 0x164   :  { %s926_s13 = scalar_lea.vmem %s1280_s29, 16  ;;  %p931_p9 = scmp.lt.s32.totalorder %s1280_s29, %s1045_s21 }
 0x165   :  { %p927_p8 = scmp.ne.s32.totalorder %s1280_s29, %s926_s13  ;;  %p932_p10 = scmp.lt.s32.totalorder %s1071_s12, %s926_s13 }
 0x167   :  { %p933_p11 = por %p932_p10, %p931_p9 }
 0x169   :  { %p934_p12 = pnand %p933_p11, %p927_p8 }
 0x16b   :  { %937 = shalt.err (!%p934_p12)  }
 0x16c   :  { %281 = dma.hbm_to_vmem [thread:$0]  %s268_s9, 16, %s1280_s29, [#allocation3 + $0xf] }
 0x16d   :  { %962 = dma.done.wait [#allocation3], 16 }
 0x16e   :  { %963 = vsyncadd [#allocation3], 4294967280 }
 0x16f   :  { %964 = dma.done.wait [#allocation3 + $0x1], 16 }
 0x170   :  { %965 = vsyncadd [#allocation3 + $0x1], 4294967280 }
 0x171   :  { %966 = dma.done.wait [#allocation3 + $0x2], 16 }
 0x172   :  { %967 = vsyncadd [#allocation3 + $0x2], 4294967280 }
 0x173   :  { %968 = dma.done.wait [#allocation3 + $0x3], 16 }
 0x174   :  { %969 = vsyncadd [#allocation3 + $0x3], 4294967280 }
 0x175   :  { %970 = dma.done.wait [#allocation3 + $0x4], 16 }
 0x176   :  { %971 = vsyncadd [#allocation3 + $0x4], 4294967280 }
 0x177   :  { %972 = dma.done.wait [#allocation3 + $0x5], 16 }
 0x178   :  { %973 = vsyncadd [#allocation3 + $0x5], 4294967280 }
 0x179   :  { %974 = dma.done.wait [#allocation3 + $0x6], 16 }
 0x17a   :  { %975 = vsyncadd [#allocation3 + $0x6], 4294967280 }
 0x17b   :  { %976 = dma.done.wait [#allocation3 + $0x7], 16 }
 0x17c   :  { %977 = vsyncadd [#allocation3 + $0x7], 4294967280 }
 0x17d   :  { %978 = dma.done.wait [#allocation3 + $0x8], 16 }
 0x17e   :  { %979 = vsyncadd [#allocation3 + $0x8], 4294967280 }
 0x17f   :  { %980 = dma.done.wait [#allocation3 + $0x9], 16 }
 0x180   :  { %981 = vsyncadd [#allocation3 + $0x9], 4294967280 }
 0x181   :  { %982 = dma.done.wait [#allocation3 + $0xa], 16 }
 0x182   :  { %983 = vsyncadd [#allocation3 + $0xa], 4294967280 }
 0x183   :  { %984 = dma.done.wait [#allocation3 + $0xb], 16 }
 0x184   :  { %985 = vsyncadd [#allocation3 + $0xb], 4294967280 }
 0x185   :  { %986 = dma.done.wait [#allocation3 + $0xc], 16 }
 0x186   :  { %987 = vsyncadd [#allocation3 + $0xc], 4294967280 }
 0x187   :  { %988 = dma.done.wait [#allocation3 + $0xd], 16 }
 0x188   :  { %989 = vsyncadd [#allocation3 + $0xd], 4294967280 }
 0x189   :  { %990 = dma.done.wait [#allocation3 + $0xe], 16 }
 0x18a   :  { %991 = vsyncadd [#allocation3 + $0xe], 4294967280 }
 0x18b   :  { %992 = dma.done.wait [#allocation3 + $0xf], 16 }
 0x18c   :  { %993 = vsyncadd [#allocation3 + $0xf], 4294967280  ;;  %s1013_s1 = smov [#allocation6]   ;;  %v314_v0 = vld [vmem:[#allocation2] sm:$0xff]  ;;  %v315_v1 = vld [vmem:[#allocation2 + $0x8] sm:$0xff] }
 0x18d   :  { %s323_s21 = sshll.u32 %s1013_s1, 4  ;;  %316 = vst [vmem:[#allocation6] sm:$0xff] %v314_v0  ;;  %317 = vst [vmem:[#allocation6 + $0x8] sm:$0xff] %v315_v1  ;;  %s324_s21 = int_to_ptr.vmem [resolvable:$true] %s323_s21 }
 0x18e   :  { %s938_s8 = scalar_lea.vmem %s324_s21, 256  ;;  %p943_p0 = scmp.lt.s32.totalorder %s324_s21, %s324_s21 }
 0x18f   :  { %p939_p13 = scmp.ne.s32.totalorder %s324_s21, %s938_s8  ;;  %p944_p1 = scmp.lt.s32.totalorder %s938_s8, %s938_s8 }
 0x191   :  { %p945_p2 = por %p944_p1, %p943_p0 }
 0x193   :  { %p946_p3 = pnand %p945_p2, %p939_p13 }
 0x195   :  { %949 = shalt.err (!%p946_p3)
}
 0x196   :  { %s950_s15 = scalar_lea.hbm %s1320_s2, 256 }
 0x197   :  { %p951_p4 = scmp.ne.s32.totalorder %s1320_s2, %s950_s15  ;;  %p954_p5 = scmp.lt.u32.totalorder %s950_s15, %s1320_s2 }
 0x199   :  { %p956_p6 = pnand %p954_p5, %p951_p4 }
 0x19b   :  { %959 = shalt.err (!%p956_p6)
}
 0x19c   :  { %s1014_s19 = smov 128   ;;  %s1015_s22 = smov 8  }
 0x19d   :  { %329 = dma.vmem_to_hbm [thread:$0]  %s324_s21, 256, %s1320_s2, [#allocation7], %s1014_s19, %s1014_s19, %s1015_s22  }
 0x19e   :  { %994 = dma.done.wait [#allocation7], 256  }
 0x19f   :  { %995 = vsyncadd [#allocation7], 4294967040 }
 0x1a0   :  { %333 = vsyncpa [#allocation7], 1 }
 0x1a1   :  { %334 = vsyncmov [#allocation3] }
 0x1a4   :  { %s335_s29 = vpop.sfrf %334 }
 0x1a5   :  { %p508_p7 = scmp.ne.s32.totalorder %s335_s29, 0 }
 0x1a7   :  { %339 = shalt.err (%p508_p7)  }
 0x1a8   :  { %341 = vsyncmov [#allocation3 + $0x1] }
 0x1ab   :  { %s342_s30 = vpop.sfrf %341 }
 0x1ac   :  { %p509_p8 = scmp.ne.s32.totalorder %s342_s30, 0 }
 0x1ae   :  { %346 = shalt.err (%p509_p8)  }
 0x1af   :  { %348 = vsyncmov [#allocation3 + $0x2] }
 0x1b2   :  { %s349_s26 = vpop.sfrf %348 }
 0x1b3   :  { %p510_p9 = scmp.ne.s32.totalorder %s349_s26, 0 }
 0x1b5   :  { %353 = shalt.err (%p510_p9)  }
 0x1b6   :  { %355 = vsyncmov [#allocation3 + $0x3] }
 0x1b9   :  { %s356_s28 = vpop.sfrf %355 }
 0x1ba   :  { %p511_p10 = scmp.ne.s32.totalorder %s356_s28, 0 }
 0x1bc   :  { %360 = shalt.err (%p511_p10)  }
 0x1bd   :  { %362 = vsyncmov [#allocation3 + $0x4] }
 0x1c0   :  { %s363_s2 = vpop.sfrf %362 }
 0x1c1   :  { %p512_p11 = scmp.ne.s32.totalorder %s363_s2, 0 }
 0x1c3   :  { %367 = shalt.err (%p512_p11)  }
 0x1c4   :  { %369 = vsyncmov [#allocation3 + $0x5] }
 0x1c7   :  { %s370_s24 = vpop.sfrf %369 }
 0x1c8   :  { %p513_p12 = scmp.ne.s32.totalorder %s370_s24, 0 }
 0x1ca   :  { %374 = shalt.err (%p513_p12)  }
 0x1cb   :  { %376 = vsyncmov [#allocation3 + $0x6] }
 0x1ce   :  { %s377_s3 = vpop.sfrf %376 }
 0x1cf   :  { %p514_p13 = scmp.ne.s32.totalorder %s377_s3, 0 }
 0x1d1   :  { %381 = shalt.err (%p514_p13)  }
 0x1d2   :  { %383 = vsyncmov [#allocation3 + $0x7] }
 0x1d5   :  { %s384_s4 = vpop.sfrf %383 }
 0x1d6   :  { %p515_p0 = scmp.ne.s32.totalorder %s384_s4, 0 }
 0x1d8   :  { %388 = shalt.err (%p515_p0)  }
 0x1d9   :  { %390 = vsyncmov [#allocation3 + $0x8] }
 0x1dc   :  { %s391_s6 = vpop.sfrf %390 }
 0x1dd   :  { %p516_p1 = scmp.ne.s32.totalorder %s391_s6, 0 }
 0x1df   :  { %395 = shalt.err (%p516_p1)  }
 0x1e0   :  { %397 = vsyncmov [#allocation3 + $0x9] }
 0x1e3   :  { %s398_s7 = vpop.sfrf %397 }
 0x1e4   :  { %p517_p2 = scmp.ne.s32.totalorder %s398_s7, 0 }
 0x1e6   :  { %402 = shalt.err (%p517_p2)  }
 0x1e7   :  { %404 = vsyncmov [#allocation3 + $0xa] }
 0x1ea   :  { %s405_s5 = vpop.sfrf %404 }
 0x1eb   :  { %p518_p3 = scmp.ne.s32.totalorder %s405_s5, 0 }
 0x1ed   :  { %409 = shalt.err (%p518_p3)  }
 0x1ee   :  { %411 = vsyncmov [#allocation3 + $0xb] }
 0x1f1   :  { %s412_s27 = vpop.sfrf %411 }
 0x1f2   :  { %p519_p4 = scmp.ne.s32.totalorder %s412_s27, 0 }
 0x1f4   :  { %416 = shalt.err (%p519_p4)  }
 0x1f5   :  { %418 = vsyncmov [#allocation3 + $0xc] }
 0x1f8   :  { %s419_s9 = vpop.sfrf %418 }
 0x1f9   :  { %p520_p5 = scmp.ne.s32.totalorder %s419_s9, 0 }
 0x1fb   :  { %423 = shalt.err (%p520_p5)  }
 0x1fc   :  { %425 = vsyncmov [#allocation3 + $0xd] }
 0x1ff   :  { %s426_s11 = vpop.sfrf %425 }
 0x200   :  { %p521_p6 = scmp.ne.s32.totalorder %s426_s11, 0 }
 0x202   :  { %430 = shalt.err (%p521_p6)  }
 0x203   :  { %432 = vsyncmov [#allocation3 + $0xe] }
 0x206   :  { %s433_s0 = vpop.sfrf %432 }
 0x207   :  { %p522_p7 = scmp.ne.s32.totalorder %s433_s0, 0 }
 0x209   :  { %437 = shalt.err (%p522_p7)  }
 0x20a   :  { %439 = vsyncmov [#allocation3 + $0xf] }
 0x20d   :  { %s440_s14 = vpop.sfrf %439 }
 0x20e   :  { %p523_p8 = scmp.ne.s32.totalorder %s440_s14, 0 }
 0x210   :  { %444 = shalt.err (%p523_p8)  }

</bundles_post_ra>
